<compile_context>
chip_gen: v5e
topology: v5e:2x2
jax: 0.10.0
libtpu: 0.0.40
codegen_flags: <defaults>
</compile_context>

<pallas_src>
import functools

import jax
import jax.numpy as jnp
from jax import lax
from jax.experimental import pallas as pl
from jax.experimental.pallas import tpu as pltpu

EPS = 1e-5
MAX_TILE_ROWS = 4096                 # cap on packed rows per grid step
STREAM_BYTES_PER_BUFFER = 1 << 20    # ~1 MiB per feature stream per pipeline buffer


def _cdiv(a, b):
    return -(-a // b)


def _round_up(a, b):
    return _cdiv(a, b) * b


def _detect_tensorcores():
    """2 on dual-TensorCore chips (v7x), else 1.  Unknown -> 1 (always correct;
    a 2-way split on a single-core chip only adds padding and extra blocks)."""
    try:
        kind = jax.devices()[0].device_kind.lower()
    except Exception:
        return 1
    return 2 if ("v7" in kind or "tpu7" in kind) else 1


def _split2(v):
    """2-term bf16 decomposition of an f32 array (v ~= hi + lo, err ~ 2^-18 |v|)."""
    hi = v.astype(jnp.bfloat16)
    lo = (v - hi.astype(jnp.float32)).astype(jnp.bfloat16)
    return hi, lo


def _split3(v):
    """3-term bf16 decomposition (err ~ 2^-27 |v|) for the mask*w operand."""
    hi = v.astype(jnp.bfloat16)
    rem = v - hi.astype(jnp.float32)
    mid = rem.astype(jnp.bfloat16)
    lo = (rem - mid.astype(jnp.float32)).astype(jnp.bfloat16)
    return hi, mid, lo


def _dot_sum(parts, rhs):
    """sum_i dot(parts[i], rhs): single-pass bf16 MXU matmuls, f32 accumulation."""
    acc = None
    for p in parts:
        t = jnp.dot(p, rhs, preferred_element_type=jnp.float32)
        acc = t if acc is None else acc + t
    return acc


def _hamil_sums_kernel(x_ref, r_ref, tid_ref, seg_ref, ctab_ref, sa_ref, sq_ref):
    """One tile of P-packed rows.

    x_ref, r_ref : [tile, W]   prediction / reference features, W = P*D lanes
    tid_ref      : [tile, P]   int32 type id per packed segment (-1 = padded row)
    seg_ref      : [W, P]      bf16 0/1 lane->segment matrix (resident)
    ctab_ref     : [Kp, W]     bf16 0/1 (type, segment)->lane mask table (resident)
    sa_ref/sq_ref: [1, 8, W]   f32 per-(sublane, lane) partial sums (accumulators)
    """
    i = pl.program_id(1)

    @pl.when(i == 0)
    def _():
        sa_ref[...] = jnp.zeros_like(sa_ref)
        sq_ref[...] = jnp.zeros_like(sq_ref)

    x = x_ref[...].astype(jnp.float32)      # [tile, W]
    r = r_ref[...].astype(jnp.float32)      # [tile, W]
    tid = tid_ref[...]                      # [tile, P]
    seg = seg_ref[...]                      # [W, P]
    ctab = ctab_ref[...]                    # [Kp, W]

    tile, w_lanes = x.shape
    n_seg = seg.shape[1]                    # P
    n_keys = ctab.shape[0]                  # Kp >= T*P
    d_orig = w_lanes // n_seg               # original feature dim D (static)

    # ---- per-original-row reference statistics via MXU segment sums --------
    sum_r = _dot_sum(_split2(r), seg)           # [tile, P]  sum_d ref
    sum_r2 = _dot_sum(_split2(r * r), seg)      # [tile, P]  sum_d ref^2
    # ||ref - mean||^2 = sum(ref^2) - (sum ref)^2 / D   (padded segments -> 0)
    var = jnp.maximum(sum_r2 - sum_r * sum_r * (1.0 / d_orig), 0.0)
    # Exact VALU divide: w is only a [tile, P] array (off the hot path), so an
    # approx EUP reciprocal buys nothing and would cost bit accuracy.
    w = 1.0 / (jnp.sqrt(var) + EPS)             # [tile, P]

    # ---- mask * w, broadcast back to lanes, in one (type, segment)-hot matmul
    # mw[i, t*P + p] = w[i, p] if tid[i, p] == t else 0.  Padded rows (tid=-1)
    # give a negative key and never match.  mw @ ctab == mask * w over lanes.
    kidx = lax.broadcasted_iota(jnp.int32, (tile, n_keys), 1)
    mw = jnp.zeros((tile, n_keys), jnp.float32)
    for sp in range(n_seg):                     # static, small (P <= 16)
        cid = tid[:, sp:sp + 1] * n_seg + sp
        mw = mw + jnp.where(kidx == cid, w[:, sp:sp + 1], 0.0)
    mwb = _dot_sum(_split3(mw), ctab)           # [tile, W] = mask * w_bcast

    # pre - tgt = w*(x - mean) - w*(ref - mean) = w*(x - ref)
    md = mwb * (x - r)                          # = mask * (pre - tgt)

    # Per-(sublane, lane) partial accumulation: leading-axis sums only (pure
    # VPU vreg adds), no per-step cross-lane work on the accumulators.
    g = tile // 8
    sa_ref[...] += jnp.sum(jnp.abs(md).reshape(g, 8, w_lanes), axis=0)[None]
    sq_ref[...] += jnp.sum((md * md).reshape(g, 8, w_lanes), axis=0)[None]


def _masked_weighted_sums(x, ref, type_ids, mask_table_bool):
    """Returns (sum |pre - tgt|, sum (pre - tgt)^2) over the selected elements."""
    R, D = x.shape
    T = mask_table_bool.shape[0]

    # Packed lane layout: P original rows per kernel row, lane width W = P*D.
    P = 1 if D >= 128 else max(1, min(128 // D, 16))
    W = P * D
    K = T * P
    Kp = _round_up(K, 8)                  # pad key axis to a clean sublane count

    ncores = _detect_tensorcores()
    rows_packed = _cdiv(R, P)
    if rows_packed < 256:                 # tiny problem: a core split only pads
        ncores = 1

    # Tile sizing / VMEM accounting: 2 feature streams x 2 pipeline buffers plus
    # ~6 [tile, W] f32 in-kernel temporaries  =>  ~12 * tile*W*4 bytes.  1 MiB
    # per stream-buffer keeps that around 12 MiB, safely inside the explicit
    # 32 MiB scoped-VMEM limit (v5e/v6e: 128 MiB physical, v7x: 64 MiB).
    budget = max(8, (STREAM_BYTES_PER_BUFFER // (W * 4)) // 8 * 8)
    rows_per_core = _cdiv(rows_packed, ncores)
    tile = max(8, min(MAX_TILE_ROWS, budget, _round_up(rows_per_core, 8)))
    tpc = _cdiv(rows_per_core, tile)
    rkp = ncores * tpc * tile             # padded packed-row count
    rp = rkp * P                          # padded original-row count
    pad = rp - R

    tid = type_ids.reshape(-1).astype(jnp.int32)
    if pad:
        # Padded rows: zero features + type id -1 -> contribute nothing.
        x = jnp.pad(x, ((0, pad), (0, 0)))
        ref = jnp.pad(ref, ((0, pad), (0, 0)))
        tid = jnp.pad(tid, (0, pad), constant_values=-1)
    xp = x.reshape(rkp, W)                # free, contiguous re-interpretation
    rfp = ref.reshape(rkp, W)
    tidp = tid.reshape(rkp, P)

    # Tiny resident 0/1 tables (exactly representable in bf16 -> single-pass MXU).
    lane = jnp.arange(W, dtype=jnp.int32)
    seg_of_lane = lane // D               # which packed segment a lane belongs to
    d_of_lane = lane % D                  # offset inside the original row
    seg = (seg_of_lane[:, None] == jnp.arange(P, dtype=jnp.int32)[None, :]
           ).astype(jnp.bfloat16)                                        # [W, P]
    k_idx = jnp.arange(Kp, dtype=jnp.int32)
    t_of_k = jnp.minimum(k_idx // P, T - 1)
    p_of_k = k_idx % P
    valid_k = (k_idx < K)[:, None]
    ctab = (valid_k
            & (p_of_k[:, None] == seg_of_lane[None, :])
            & mask_table_bool[t_of_k][:, d_of_lane]).astype(jnp.bfloat16)  # [Kp, W]

    acc_shape = jax.ShapeDtypeStruct((ncores, 8, W), jnp.float32)
    row_map = lambda c, i: (c * tpc + i, 0)

    sa, sq = pl.pallas_call(
        _hamil_sums_kernel,
        out_shape=(acc_shape, acc_shape),
        grid=(ncores, tpc),
        in_specs=[
            pl.BlockSpec((tile, W), row_map),            # prediction features
            pl.BlockSpec((tile, W), row_map),            # reference features
            pl.BlockSpec((tile, P), row_map),            # per-segment type ids
            pl.BlockSpec((W, P), lambda c, i: (0, 0)),   # segment-sum matrix
            pl.BlockSpec((Kp, W), lambda c, i: (0, 0)),  # (type, seg) mask table
        ],
        out_specs=(pl.BlockSpec((1, 8, W), lambda c, i: (c, 0, 0)),
                   pl.BlockSpec((1, 8, W), lambda c, i: (c, 0, 0))),
        compiler_params=pltpu.CompilerParams(
            dimension_semantics=("parallel", "arbitrary"),
            vmem_limit_bytes=32 * 1024 * 1024),
    )(xp, rfp, tidp, seg, ctab)

    # Tiny final reduction of the per-core / per-lane partials in plain JAX.
    return jnp.sum(sa), jnp.sum(sq)


def _block_loss(x, ref, type_ids, mask_table_bool):
    sa, sq = _masked_weighted_sums(x, ref, type_ids, mask_table_bool)
    # The selected-element count depends only on the type ids + mask table, so
    # it is computed here on tiny arrays (saves a third in-kernel accumulator).
    per_type = jnp.sum(mask_table_bool.astype(jnp.float32), axis=-1)
    cnt = jnp.sum(per_type[type_ids.reshape(-1)])
    # L1Loss (mean) + sqrt(MSELoss (mean)) over the boolean-selected elements.
    return sa / cnt + jnp.sqrt(sq / cnt)


@functools.partial(jax.jit, static_argnames=("overlap",))
def hamil_loss(data, ref_data, mask_to_nrme, mask_to_erme, overlap=False):
    """JAX/Pallas equivalent of HamilLoss.forward."""
    atom_type = data["atom_type"].reshape(-1)
    edge_type = data["edge_type"].reshape(-1)

    onsite_loss = _block_loss(data["node_features"], ref_data["node_features"],
                              atom_type, mask_to_nrme)
    hopping_loss = _block_loss(data["edge_features"], ref_data["edge_features"],
                               edge_type, mask_to_erme)
    if overlap:
        hopping_loss = hopping_loss + _block_loss(
            data["edge_overlap"], ref_data["edge_overlap"], edge_type, mask_to_erme)
    return hopping_loss + onsite_loss


# -------------------- pure-JAX reference (for verification) --------------------
def _ref_block_loss(x, ref, mask_bool):
    mean = jnp.mean(ref, axis=-1, keepdims=True)
    cr = ref - mean
    w = 1.0 / (jnp.linalg.norm(cr, axis=-1, keepdims=True) + EPS)
    pre = w * (x - mean)
    tgt = w * cr
    m = mask_bool.astype(jnp.float32)
    diff = pre - tgt
    cnt = jnp.sum(m)
    l1 = jnp.sum(m * jnp.abs(diff)) / cnt
    mse = jnp.sum(m * diff * diff) / cnt
    return l1 + jnp.sqrt(mse)


def hamil_loss_ref(data, ref_data, mask_to_nrme, mask_to_erme):
    node_mask = mask_to_nrme[data["atom_type"].reshape(-1)]
    edge_mask = mask_to_erme[data["edge_type"].reshape(-1)]
    onsite = _ref_block_loss(data["node_features"],
                             ref_data["node_features"], node_mask)
    hopping = _ref_block_loss(data["edge_features"],
                              ref_data["edge_features"], edge_mask)
    return hopping + onsite


# ------------------------------------ main ------------------------------------
if __name__ == "__main__":
    key = jax.random.PRNGKey(0)
    kn, ke, krn, kre, kat, ket, kmn, kme = jax.random.split(key, 8)

    N_NODES, D_NODE = 10, 13      # per-atom reduced H-block irreps
    N_EDGES, D_EDGE = 20, 25      # per-bond reduced H-block irreps
    N_ATOM_TYPES, N_BOND_TYPES = 2, 3

    data = {
        "node_features": jax.random.normal(kn, (N_NODES, D_NODE), jnp.float32),
        "edge_features": jax.random.normal(ke, (N_EDGES, D_EDGE), jnp.float32),
        "atom_type": jax.random.randint(kat, (N_NODES, 1), 0, N_ATOM_TYPES),
        "edge_type": jax.random.randint(ket, (N_EDGES, 1), 0, N_BOND_TYPES),
    }
    ref_data = {
        "node_features": jax.random.normal(krn, (N_NODES, D_NODE), jnp.float32),
        "edge_features": jax.random.normal(kre, (N_EDGES, D_EDGE), jnp.float32),
    }

    # Synthetic OrbitalMapper masks ("which reduced matrix elements exist for
    # this atom/bond type"); ensure at least one True per row.
    mask_to_nrme = jax.random.bernoulli(kmn, 0.6, (N_ATOM_TYPES, D_NODE))
    mask_to_nrme = mask_to_nrme.at[:, 0].set(True)
    mask_to_erme = jax.random.bernoulli(kme, 0.6, (N_BOND_TYPES, D_EDGE))
    mask_to_erme = mask_to_erme.at[:, 0].set(True)

    out = hamil_loss(data, ref_data, mask_to_nrme, mask_to_erme)
    out = jax.block_until_ready(out)

    expected = hamil_loss_ref(data, ref_data, mask_to_nrme, mask_to_erme)
    assert jnp.allclose(out, expected, rtol=1e-5, atol=1e-5), (out, expected)

    print("KERNEL_OK")
</pallas_src>

<mosaic_0001>
module attributes {stable_mosaic.version = 11 : i64} {
  func.func @_hamil_sums_kernel(%arg0: i32, %arg1: i32, %arg2: memref<8x125xf32, #tpu.memory_space<vmem>>, %arg3: memref<8x125xf32, #tpu.memory_space<vmem>>, %arg4: memref<8x5xi32, #tpu.memory_space<vmem>>, %arg5: memref<125x5xbf16, #tpu.memory_space<vmem>>, %arg6: memref<16x125xbf16, #tpu.memory_space<vmem>>, %arg7: memref<1x8x125xf32, #tpu.memory_space<vmem>>, %arg8: memref<1x8x125xf32, #tpu.memory_space<vmem>>) attributes {dimension_semantics = [#tpu.dimension_semantics<parallel>, #tpu.dimension_semantics<arbitrary>], iteration_bounds = array<i64: 1, 1>, scalar_prefetch = 0 : i64, scratch_operands = 0 : i64, tpu.core_type = #tpu.core_type<tc>, window_params = [{transform_indices = @transform_0, window_bounds = array<i64: 8, 125>}, {transform_indices = @transform_1, window_bounds = array<i64: 8, 125>}, {transform_indices = @transform_2, window_bounds = array<i64: 8, 5>}, {pipeline_mode = #tpu.pipeline_mode<synchronous>, transform_indices = @transform_3, window_bounds = array<i64: 125, 5>}, {pipeline_mode = #tpu.pipeline_mode<synchronous>, transform_indices = @transform_4, window_bounds = array<i64: 16, 125>}, {transform_indices = @transform_5, window_bounds = array<i64: 1, 8, 125>}, {transform_indices = @transform_6, window_bounds = array<i64: 1, 8, 125>}]} {
    %c0_i32 = arith.constant 0 : i32
    %0 = arith.cmpi eq, %arg1, %c0_i32 : i32
    %1 = arith.extui %0 : i1 to i32
    %c0_i32_0 = arith.constant 0 : i32
    %2 = arith.cmpi ne, %1, %c0_i32_0 : i32
    scf.if %2 {
      %cst_45 = arith.constant 0.000000e+00 : f32
      %129 = vector.broadcast %cst_45 : f32 to vector<1x8x125xf32>
      %c0_46 = arith.constant 0 : index
      %c0_47 = arith.constant 0 : index
      %c0_48 = arith.constant 0 : index
      %130 = vector.load %arg7[%c0_46, %c0_47, %c0_48] : memref<1x8x125xf32, #tpu.memory_space<vmem>>, vector<1x8x125xf32>
      tpu.vector_store %arg7[%c0_46, %c0_47, %c0_48], %129 {strides = array<i32>} : memref<1x8x125xf32, #tpu.memory_space<vmem>>, vector<1x8x125xf32>,
      %cst_49 = arith.constant 0.000000e+00 : f32
      %131 = vector.broadcast %cst_49 : f32 to vector<1x8x125xf32>
      %c0_50 = arith.constant 0 : index
      %c0_51 = arith.constant 0 : index
      %c0_52 = arith.constant 0 : index
      %132 = vector.load %arg8[%c0_50, %c0_51, %c0_52] : memref<1x8x125xf32, #tpu.memory_space<vmem>>, vector<1x8x125xf32>
      tpu.vector_store %arg8[%c0_50, %c0_51, %c0_52], %131 {strides = array<i32>} : memref<1x8x125xf32, #tpu.memory_space<vmem>>, vector<1x8x125xf32>,
    } else {
    }
    %c0 = arith.constant 0 : index
    %c0_1 = arith.constant 0 : index
    %3 = vector.load %arg2[%c0, %c0_1] : memref<8x125xf32, #tpu.memory_space<vmem>>, vector<8x125xf32>
    %c0_2 = arith.constant 0 : index
    %c0_3 = arith.constant 0 : index
    %4 = vector.load %arg3[%c0_2, %c0_3] : memref<8x125xf32, #tpu.memory_space<vmem>>, vector<8x125xf32>
    %c0_4 = arith.constant 0 : index
    %c0_5 = arith.constant 0 : index
    %5 = vector.load %arg4[%c0_4, %c0_5] : memref<8x5xi32, #tpu.memory_space<vmem>>, vector<8x5xi32>
    %c0_6 = arith.constant 0 : index
    %c0_7 = arith.constant 0 : index
    %6 = vector.load %arg5[%c0_6, %c0_7] : memref<125x5xbf16, #tpu.memory_space<vmem>>, vector<125x5xbf16>
    %c0_8 = arith.constant 0 : index
    %c0_9 = arith.constant 0 : index
    %7 = vector.load %arg6[%c0_8, %c0_9] : memref<16x125xbf16, #tpu.memory_space<vmem>>, vector<16x125xbf16>
    %8 = arith.truncf %4 : vector<8x125xf32> to vector<8x125xbf16>
    %9 = arith.extf %8 : vector<8x125xbf16> to vector<8x125xf32>
    %10 = arith.subf %4, %9 : vector<8x125xf32>
    %11 = arith.truncf %10 : vector<8x125xf32> to vector<8x125xbf16>
    %cst = arith.constant dense<0.000000e+00> : vector<8x5xf32>
    %12 = tpu.matmul %8, %6, %cst {dimension_numbers = #tpu.dot_dimension_numbers<[1], [0], [0], [1], [0, 0, 1, 1], [], []>} : vector<8x125xbf16>, vector<125x5xbf16>, vector<8x5xf32> -> vector<8x5xf32>
    %cst_10 = arith.constant dense<0.000000e+00> : vector<8x5xf32>
    %13 = tpu.matmul %11, %6, %cst_10 {dimension_numbers = #tpu.dot_dimension_numbers<[1], [0], [0], [1], [0, 0, 1, 1], [], []>} : vector<8x125xbf16>, vector<125x5xbf16>, vector<8x5xf32> -> vector<8x5xf32>
    %14 = arith.addf %12, %13 : vector<8x5xf32>
    %15 = arith.mulf %4, %4 : vector<8x125xf32>
    %16 = arith.truncf %15 : vector<8x125xf32> to vector<8x125xbf16>
    %17 = arith.extf %16 : vector<8x125xbf16> to vector<8x125xf32>
    %18 = arith.subf %15, %17 : vector<8x125xf32>
    %19 = arith.truncf %18 : vector<8x125xf32> to vector<8x125xbf16>
    %cst_11 = arith.constant dense<0.000000e+00> : vector<8x5xf32>
    %20 = tpu.matmul %16, %6, %cst_11 {dimension_numbers = #tpu.dot_dimension_numbers<[1], [0], [0], [1], [0, 0, 1, 1], [], []>} : vector<8x125xbf16>, vector<125x5xbf16>, vector<8x5xf32> -> vector<8x5xf32>
    %cst_12 = arith.constant dense<0.000000e+00> : vector<8x5xf32>
    %21 = tpu.matmul %19, %6, %cst_12 {dimension_numbers = #tpu.dot_dimension_numbers<[1], [0], [0], [1], [0, 0, 1, 1], [], []>} : vector<8x125xbf16>, vector<125x5xbf16>, vector<8x5xf32> -> vector<8x5xf32>
    %22 = arith.addf %20, %21 : vector<8x5xf32>
    %23 = arith.mulf %14, %14 : vector<8x5xf32>
    %cst_13 = arith.constant 4.000000e-02 : f32
    %24 = vector.broadcast %cst_13 : f32 to vector<8x5xf32>
    %25 = arith.mulf %23, %24 : vector<8x5xf32>
    %26 = arith.subf %22, %25 : vector<8x5xf32>
    %cst_14 = arith.constant 0.000000e+00 : f32
    %27 = vector.broadcast %cst_14 : f32 to vector<8x5xf32>
    %28 = arith.maximumf %26, %27 : vector<8x5xf32>
    %29 = math.sqrt %28 : vector<8x5xf32>
    %cst_15 = arith.constant 9.99999974E-6 : f32
    %30 = vector.broadcast %cst_15 : f32 to vector<8x5xf32>
    %31 = arith.addf %29, %30 : vector<8x5xf32>
    %cst_16 = arith.constant 1.000000e+00 : f32
    %32 = vector.broadcast %cst_16 : f32 to vector<8x5xf32>
    %33 = arith.divf %32, %31 : vector<8x5xf32>
    %34 = tpu.iota {dimensions = array<i32: 1>} : vector<8x16xi32>
    %cst_17 = arith.constant 0.000000e+00 : f32
    %35 = vector.broadcast %cst_17 : f32 to vector<8x16xf32>
    %36 = vector.extract_strided_slice %5 {offsets = [0, 0], sizes = [8, 1], strides = [1, 1]} : vector<8x5xi32> to vector<8x1xi32>
    %c5_i32 = arith.constant 5 : i32
    %37 = vector.broadcast %c5_i32 : i32 to vector<8x1xi32>
    %38 = arith.muli %36, %37 : vector<8x1xi32>
    %c0_i32_18 = arith.constant 0 : i32
    %39 = vector.broadcast %c0_i32_18 : i32 to vector<8x1xi32>
    %40 = arith.addi %38, %39 : vector<8x1xi32>
    %41 = vector.broadcast %40 : vector<8x1xi32> to vector<8x16xi32>
    %42 = arith.cmpi eq, %34, %41 : vector<8x16xi32>
    %43 = vector.extract_strided_slice %33 {offsets = [0, 0], sizes = [8, 1], strides = [1, 1]} : vector<8x5xf32> to vector<8x1xf32>
    %cst_19 = arith.constant 0.000000e+00 : f32
    %44 = vector.shape_cast %43 : vector<8x1xf32> to vector<8x1xf32>
    %45 = vector.broadcast %44 : vector<8x1xf32> to vector<8x16xf32>
    %46 = vector.broadcast %cst_19 : f32 to vector<8x16xf32>
    %47 = arith.select %42, %45, %46 : vector<8x16xi1>, vector<8x16xf32>
    %48 = arith.addf %35, %47 : vector<8x16xf32>
    %49 = vector.extract_strided_slice %5 {offsets = [0, 1], sizes = [8, 1], strides = [1, 1]} : vector<8x5xi32> to vector<8x1xi32>
    %c5_i32_20 = arith.constant 5 : i32
    %50 = vector.broadcast %c5_i32_20 : i32 to vector<8x1xi32>
    %51 = arith.muli %49, %50 : vector<8x1xi32>
    %c1_i32 = arith.constant 1 : i32
    %52 = vector.broadcast %c1_i32 : i32 to vector<8x1xi32>
    %53 = arith.addi %51, %52 : vector<8x1xi32>
    %54 = vector.broadcast %53 : vector<8x1xi32> to vector<8x16xi32>
    %55 = arith.cmpi eq, %34, %54 : vector<8x16xi32>
    %56 = vector.extract_strided_slice %33 {offsets = [0, 1], sizes = [8, 1], strides = [1, 1]} : vector<8x5xf32> to vector<8x1xf32>
    %cst_21 = arith.constant 0.000000e+00 : f32
    %57 = vector.shape_cast %56 : vector<8x1xf32> to vector<8x1xf32>
    %58 = vector.broadcast %57 : vector<8x1xf32> to vector<8x16xf32>
    %59 = vector.broadcast %cst_21 : f32 to vector<8x16xf32>
    %60 = arith.select %55, %58, %59 : vector<8x16xi1>, vector<8x16xf32>
    %61 = arith.addf %48, %60 : vector<8x16xf32>
    %62 = vector.extract_strided_slice %5 {offsets = [0, 2], sizes = [8, 1], strides = [1, 1]} : vector<8x5xi32> to vector<8x1xi32>
    %c5_i32_22 = arith.constant 5 : i32
    %63 = vector.broadcast %c5_i32_22 : i32 to vector<8x1xi32>
    %64 = arith.muli %62, %63 : vector<8x1xi32>
    %c2_i32 = arith.constant 2 : i32
    %65 = vector.broadcast %c2_i32 : i32 to vector<8x1xi32>
    %66 = arith.addi %64, %65 : vector<8x1xi32>
    %67 = vector.broadcast %66 : vector<8x1xi32> to vector<8x16xi32>
    %68 = arith.cmpi eq, %34, %67 : vector<8x16xi32>
    %69 = vector.extract_strided_slice %33 {offsets = [0, 2], sizes = [8, 1], strides = [1, 1]} : vector<8x5xf32> to vector<8x1xf32>
    %cst_23 = arith.constant 0.000000e+00 : f32
    %70 = vector.shape_cast %69 : vector<8x1xf32> to vector<8x1xf32>
    %71 = vector.broadcast %70 : vector<8x1xf32> to vector<8x16xf32>
    %72 = vector.broadcast %cst_23 : f32 to vector<8x16xf32>
    %73 = arith.select %68, %71, %72 : vector<8x16xi1>, vector<8x16xf32>
    %74 = arith.addf %61, %73 : vector<8x16xf32>
    %75 = vector.extract_strided_slice %5 {offsets = [0, 3], sizes = [8, 1], strides = [1, 1]} : vector<8x5xi32> to vector<8x1xi32>
    %c5_i32_24 = arith.constant 5 : i32
    %76 = vector.broadcast %c5_i32_24 : i32 to vector<8x1xi32>
    %77 = arith.muli %75, %76 : vector<8x1xi32>
    %c3_i32 = arith.constant 3 : i32
    %78 = vector.broadcast %c3_i32 : i32 to vector<8x1xi32>
    %79 = arith.addi %77, %78 : vector<8x1xi32>
    %80 = vector.broadcast %79 : vector<8x1xi32> to vector<8x16xi32>
    %81 = arith.cmpi eq, %34, %80 : vector<8x16xi32>
    %82 = vector.extract_strided_slice %33 {offsets = [0, 3], sizes = [8, 1], strides = [1, 1]} : vector<8x5xf32> to vector<8x1xf32>
    %cst_25 = arith.constant 0.000000e+00 : f32
    %83 = vector.shape_cast %82 : vector<8x1xf32> to vector<8x1xf32>
    %84 = vector.broadcast %83 : vector<8x1xf32> to vector<8x16xf32>
    %85 = vector.broadcast %cst_25 : f32 to vector<8x16xf32>
    %86 = arith.select %81, %84, %85 : vector<8x16xi1>, vector<8x16xf32>
    %87 = arith.addf %74, %86 : vector<8x16xf32>
    %88 = vector.extract_strided_slice %5 {offsets = [0, 4], sizes = [8, 1], strides = [1, 1]} : vector<8x5xi32> to vector<8x1xi32>
    %c5_i32_26 = arith.constant 5 : i32
    %89 = vector.broadcast %c5_i32_26 : i32 to vector<8x1xi32>
    %90 = arith.muli %88, %89 : vector<8x1xi32>
    %c4_i32 = arith.constant 4 : i32
    %91 = vector.broadcast %c4_i32 : i32 to vector<8x1xi32>
    %92 = arith.addi %90, %91 : vector<8x1xi32>
    %93 = vector.broadcast %92 : vector<8x1xi32> to vector<8x16xi32>
    %94 = arith.cmpi eq, %34, %93 : vector<8x16xi32>
    %95 = vector.extract_strided_slice %33 {offsets = [0, 4], sizes = [8, 1], strides = [1, 1]} : vector<8x5xf32> to vector<8x1xf32>
    %cst_27 = arith.constant 0.000000e+00 : f32
    %96 = vector.shape_cast %95 : vector<8x1xf32> to vector<8x1xf32>
    %97 = vector.broadcast %96 : vector<8x1xf32> to vector<8x16xf32>
    %98 = vector.broadcast %cst_27 : f32 to vector<8x16xf32>
    %99 = arith.select %94, %97, %98 : vector<8x16xi1>, vector<8x16xf32>
    %100 = arith.addf %87, %99 : vector<8x16xf32>
    %101 = arith.truncf %100 : vector<8x16xf32> to vector<8x16xbf16>
    %102 = arith.extf %101 : vector<8x16xbf16> to vector<8x16xf32>
    %103 = arith.subf %100, %102 : vector<8x16xf32>
    %104 = arith.truncf %103 : vector<8x16xf32> to vector<8x16xbf16>
    %105 = arith.extf %104 : vector<8x16xbf16> to vector<8x16xf32>
    %106 = arith.subf %103, %105 : vector<8x16xf32>
    %107 = arith.truncf %106 : vector<8x16xf32> to vector<8x16xbf16>
    %cst_28 = arith.constant dense<0.000000e+00> : vector<8x125xf32>
    %108 = tpu.matmul %101, %7, %cst_28 {dimension_numbers = #tpu.dot_dimension_numbers<[1], [0], [0], [1], [0, 0, 1, 1], [], []>} : vector<8x16xbf16>, vector<16x125xbf16>, vector<8x125xf32> -> vector<8x125xf32>
    %cst_29 = arith.constant dense<0.000000e+00> : vector<8x125xf32>
    %109 = tpu.matmul %104, %7, %cst_29 {dimension_numbers = #tpu.dot_dimension_numbers<[1], [0], [0], [1], [0, 0, 1, 1], [], []>} : vector<8x16xbf16>, vector<16x125xbf16>, vector<8x125xf32> -> vector<8x125xf32>
    %110 = arith.addf %108, %109 : vector<8x125xf32>
    %cst_30 = arith.constant dense<0.000000e+00> : vector<8x125xf32>
    %111 = tpu.matmul %107, %7, %cst_30 {dimension_numbers = #tpu.dot_dimension_numbers<[1], [0], [0], [1], [0, 0, 1, 1], [], []>} : vector<8x16xbf16>, vector<16x125xbf16>, vector<8x125xf32> -> vector<8x125xf32>
    %112 = arith.addf %110, %111 : vector<8x125xf32>
    %113 = arith.subf %3, %4 : vector<8x125xf32>
    %114 = arith.mulf %112, %113 : vector<8x125xf32>
    %c0_31 = arith.constant 0 : index
    %c0_32 = arith.constant 0 : index
    %c0_33 = arith.constant 0 : index
    %115 = vector.load %arg7[%c0_31, %c0_32, %c0_33] : memref<1x8x125xf32, #tpu.memory_space<vmem>>, vector<1x8x125xf32>
    %116 = math.absf %114 : vector<8x125xf32>
    %117 = vector.shape_cast %116 : vector<8x125xf32> to vector<1x8x125xf32>
    %cst_34 = arith.constant dense<0.000000e+00> : vector<8x125xf32>
    %118 = vector.multi_reduction <add>, %117, %cst_34 [0] : vector<1x8x125xf32> to vector<8x125xf32>
    %119 = vector.shape_cast %118 : vector<8x125xf32> to vector<1x8x125xf32>
    %120 = arith.addf %115, %119 : vector<1x8x125xf32>
    %c0_35 = arith.constant 0 : index
    %c0_36 = arith.constant 0 : index
    %c0_37 = arith.constant 0 : index
    %121 = vector.load %arg7[%c0_35, %c0_36, %c0_37] : memref<1x8x125xf32, #tpu.memory_space<vmem>>, vector<1x8x125xf32>
    tpu.vector_store %arg7[%c0_35, %c0_36, %c0_37], %120 {strides = array<i32>} : memref<1x8x125xf32, #tpu.memory_space<vmem>>, vector<1x8x125xf32>,
    %c0_38 = arith.constant 0 : index
    %c0_39 = arith.constant 0 : index
    %c0_40 = arith.constant 0 : index
    %122 = vector.load %arg8[%c0_38, %c0_39, %c0_40] : memref<1x8x125xf32, #tpu.memory_space<vmem>>, vector<1x8x125xf32>
    %123 = arith.mulf %114, %114 : vector<8x125xf32>
    %124 = vector.shape_cast %123 : vector<8x125xf32> to vector<1x8x125xf32>
    %cst_41 = arith.constant dense<0.000000e+00> : vector<8x125xf32>
    %125 = vector.multi_reduction <add>, %124, %cst_41 [0] : vector<1x8x125xf32> to vector<8x125xf32>
    %126 = vector.shape_cast %125 : vector<8x125xf32> to vector<1x8x125xf32>
    %127 = arith.addf %122, %126 : vector<1x8x125xf32>
    %c0_42 = arith.constant 0 : index
    %c0_43 = arith.constant 0 : index
    %c0_44 = arith.constant 0 : index
    %128 = vector.load %arg8[%c0_42, %c0_43, %c0_44] : memref<1x8x125xf32, #tpu.memory_space<vmem>>, vector<1x8x125xf32>
    tpu.vector_store %arg8[%c0_42, %c0_43, %c0_44], %127 {strides = array<i32>} : memref<1x8x125xf32, #tpu.memory_space<vmem>>, vector<1x8x125xf32>,
    return
  }
  func.func @transform_0(%arg0: i32, %arg1: i32) -> (i32, i32) {
    %c1_i32 = arith.constant 1 : i32
    %0 = arith.muli %arg0, %c1_i32 : i32
    %1 = arith.addi %0, %arg1 : i32
    %c0_i32 = arith.constant 0 : i32
    %c0_i32_0 = arith.constant 0 : i32
    return %1, %c0_i32 : i32, i32
  }
  func.func @transform_1(%arg0: i32, %arg1: i32) -> (i32, i32) {
    %c1_i32 = arith.constant 1 : i32
    %0 = arith.muli %arg0, %c1_i32 : i32
    %1 = arith.addi %0, %arg1 : i32
    %c0_i32 = arith.constant 0 : i32
    %c0_i32_0 = arith.constant 0 : i32
    return %1, %c0_i32 : i32, i32
  }
  func.func @transform_2(%arg0: i32, %arg1: i32) -> (i32, i32) {
    %c1_i32 = arith.constant 1 : i32
    %0 = arith.muli %arg0, %c1_i32 : i32
    %1 = arith.addi %0, %arg1 : i32
    %c0_i32 = arith.constant 0 : i32
    %c0_i32_0 = arith.constant 0 : i32
    return %1, %c0_i32 : i32, i32
  }
  func.func @transform_3(%arg0: i32, %arg1: i32) -> (i32, i32) {
    %c0_i32 = arith.constant 0 : i32
    %c0_i32_0 = arith.constant 0 : i32
    %c0_i32_1 = arith.constant 0 : i32
    return %c0_i32, %c0_i32_0 : i32, i32
  }
  func.func @transform_4(%arg0: i32, %arg1: i32) -> (i32, i32) {
    %c0_i32 = arith.constant 0 : i32
    %c0_i32_0 = arith.constant 0 : i32
    %c0_i32_1 = arith.constant 0 : i32
    return %c0_i32, %c0_i32_0 : i32, i32
  }
  func.func @transform_5(%arg0: i32, %arg1: i32) -> (i32, i32, i32) {
    %c0_i32 = arith.constant 0 : i32
    %c0_i32_0 = arith.constant 0 : i32
    %c0_i32_1 = arith.constant 0 : i32
    return %arg0, %c0_i32, %c0_i32_0 : i32, i32, i32
  }
  func.func @transform_6(%arg0: i32, %arg1: i32) -> (i32, i32, i32) {
    %c0_i32 = arith.constant 0 : i32
    %c0_i32_0 = arith.constant 0 : i32
    %c0_i32_1 = arith.constant 0 : i32
    return %arg0, %c0_i32, %c0_i32_0 : i32, i32, i32
  }
}

module attributes {stable_mosaic.version = 11 : i64} {
  func.func @_hamil_sums_kernel(%arg0: i32, %arg1: i32, %arg2: memref<8x117xf32, #tpu.memory_space<vmem>>, %arg3: memref<8x117xf32, #tpu.memory_space<vmem>>, %arg4: memref<8x9xi32, #tpu.memory_space<vmem>>, %arg5: memref<117x9xbf16, #tpu.memory_space<vmem>>, %arg6: memref<24x117xbf16, #tpu.memory_space<vmem>>, %arg7: memref<1x8x117xf32, #tpu.memory_space<vmem>>, %arg8: memref<1x8x117xf32, #tpu.memory_space<vmem>>) attributes {dimension_semantics = [#tpu.dimension_semantics<parallel>, #tpu.dimension_semantics<arbitrary>], iteration_bounds = array<i64: 1, 1>, scalar_prefetch = 0 : i64, scratch_operands = 0 : i64, tpu.core_type = #tpu.core_type<tc>, window_params = [{transform_indices = @transform_0, window_bounds = array<i64: 8, 117>}, {transform_indices = @transform_1, window_bounds = array<i64: 8, 117>}, {transform_indices = @transform_2, window_bounds = array<i64: 8, 9>}, {pipeline_mode = #tpu.pipeline_mode<synchronous>, transform_indices = @transform_3, window_bounds = array<i64: 117, 9>}, {pipeline_mode = #tpu.pipeline_mode<synchronous>, transform_indices = @transform_4, window_bounds = array<i64: 24, 117>}, {transform_indices = @transform_5, window_bounds = array<i64: 1, 8, 117>}, {transform_indices = @transform_6, window_bounds = array<i64: 1, 8, 117>}]} {
    %c0_i32 = arith.constant 0 : i32
    %0 = arith.cmpi eq, %arg1, %c0_i32 : i32
    %1 = arith.extui %0 : i1 to i32
    %c0_i32_0 = arith.constant 0 : i32
    %2 = arith.cmpi ne, %1, %c0_i32_0 : i32
    scf.if %2 {
      %cst_53 = arith.constant 0.000000e+00 : f32
      %181 = vector.broadcast %cst_53 : f32 to vector<1x8x117xf32>
      %c0_54 = arith.constant 0 : index
      %c0_55 = arith.constant 0 : index
      %c0_56 = arith.constant 0 : index
      %182 = vector.load %arg7[%c0_54, %c0_55, %c0_56] : memref<1x8x117xf32, #tpu.memory_space<vmem>>, vector<1x8x117xf32>
      tpu.vector_store %arg7[%c0_54, %c0_55, %c0_56], %181 {strides = array<i32>} : memref<1x8x117xf32, #tpu.memory_space<vmem>>, vector<1x8x117xf32>,
      %cst_57 = arith.constant 0.000000e+00 : f32
      %183 = vector.broadcast %cst_57 : f32 to vector<1x8x117xf32>
      %c0_58 = arith.constant 0 : index
      %c0_59 = arith.constant 0 : index
      %c0_60 = arith.constant 0 : index
      %184 = vector.load %arg8[%c0_58, %c0_59, %c0_60] : memref<1x8x117xf32, #tpu.memory_space<vmem>>, vector<1x8x117xf32>
      tpu.vector_store %arg8[%c0_58, %c0_59, %c0_60], %183 {strides = array<i32>} : memref<1x8x117xf32, #tpu.memory_space<vmem>>, vector<1x8x117xf32>,
    } else {
    }
    %c0 = arith.constant 0 : index
    %c0_1 = arith.constant 0 : index
    %3 = vector.load %arg2[%c0, %c0_1] : memref<8x117xf32, #tpu.memory_space<vmem>>, vector<8x117xf32>
    %c0_2 = arith.constant 0 : index
    %c0_3 = arith.constant 0 : index
    %4 = vector.load %arg3[%c0_2, %c0_3] : memref<8x117xf32, #tpu.memory_space<vmem>>, vector<8x117xf32>
    %c0_4 = arith.constant 0 : index
    %c0_5 = arith.constant 0 : index
    %5 = vector.load %arg4[%c0_4, %c0_5] : memref<8x9xi32, #tpu.memory_space<vmem>>, vector<8x9xi32>
    %c0_6 = arith.constant 0 : index
    %c0_7 = arith.constant 0 : index
    %6 = vector.load %arg5[%c0_6, %c0_7] : memref<117x9xbf16, #tpu.memory_space<vmem>>, vector<117x9xbf16>
    %c0_8 = arith.constant 0 : index
    %c0_9 = arith.constant 0 : index
    %7 = vector.load %arg6[%c0_8, %c0_9] : memref<24x117xbf16, #tpu.memory_space<vmem>>, vector<24x117xbf16>
    %8 = arith.truncf %4 : vector<8x117xf32> to vector<8x117xbf16>
    %9 = arith.extf %8 : vector<8x117xbf16> to vector<8x117xf32>
    %10 = arith.subf %4, %9 : vector<8x117xf32>
    %11 = arith.truncf %10 : vector<8x117xf32> to vector<8x117xbf16>
    %cst = arith.constant dense<0.000000e+00> : vector<8x9xf32>
    %12 = tpu.matmul %8, %6, %cst {dimension_numbers = #tpu.dot_dimension_numbers<[1], [0], [0], [1], [0, 0, 1, 1], [], []>} : vector<8x117xbf16>, vector<117x9xbf16>, vector<8x9xf32> -> vector<8x9xf32>
    %cst_10 = arith.constant dense<0.000000e+00> : vector<8x9xf32>
    %13 = tpu.matmul %11, %6, %cst_10 {dimension_numbers = #tpu.dot_dimension_numbers<[1], [0], [0], [1], [0, 0, 1, 1], [], []>} : vector<8x117xbf16>, vector<117x9xbf16>, vector<8x9xf32> -> vector<8x9xf32>
    %14 = arith.addf %12, %13 : vector<8x9xf32>
    %15 = arith.mulf %4, %4 : vector<8x117xf32>
    %16 = arith.truncf %15 : vector<8x117xf32> to vector<8x117xbf16>
    %17 = arith.extf %16 : vector<8x117xbf16> to vector<8x117xf32>
    %18 = arith.subf %15, %17 : vector<8x117xf32>
    %19 = arith.truncf %18 : vector<8x117xf32> to vector<8x117xbf16>
    %cst_11 = arith.constant dense<0.000000e+00> : vector<8x9xf32>
    %20 = tpu.matmul %16, %6, %cst_11 {dimension_numbers = #tpu.dot_dimension_numbers<[1], [0], [0], [1], [0, 0, 1, 1], [], []>} : vector<8x117xbf16>, vector<117x9xbf16>, vector<8x9xf32> -> vector<8x9xf32>
    %cst_12 = arith.constant dense<0.000000e+00> : vector<8x9xf32>
    %21 = tpu.matmul %19, %6, %cst_12 {dimension_numbers = #tpu.dot_dimension_numbers<[1], [0], [0], [1], [0, 0, 1, 1], [], []>} : vector<8x117xbf16>, vector<117x9xbf16>, vector<8x9xf32> -> vector<8x9xf32>
    %22 = arith.addf %20, %21 : vector<8x9xf32>
    %23 = arith.mulf %14, %14 : vector<8x9xf32>
    %cst_13 = arith.constant 0.0769230798 : f32
    %24 = vector.broadcast %cst_13 : f32 to vector<8x9xf32>
    %25 = arith.mulf %23, %24 : vector<8x9xf32>
    %26 = arith.subf %22, %25 : vector<8x9xf32>
    %cst_14 = arith.constant 0.000000e+00 : f32
    %27 = vector.broadcast %cst_14 : f32 to vector<8x9xf32>
    %28 = arith.maximumf %26, %27 : vector<8x9xf32>
    %29 = math.sqrt %28 : vector<8x9xf32>
    %cst_15 = arith.constant 9.99999974E-6 : f32
    %30 = vector.broadcast %cst_15 : f32 to vector<8x9xf32>
    %31 = arith.addf %29, %30 : vector<8x9xf32>
    %cst_16 = arith.constant 1.000000e+00 : f32
    %32 = vector.broadcast %cst_16 : f32 to vector<8x9xf32>
    %33 = arith.divf %32, %31 : vector<8x9xf32>
    %34 = tpu.iota {dimensions = array<i32: 1>} : vector<8x24xi32>
    %cst_17 = arith.constant 0.000000e+00 : f32
    %35 = vector.broadcast %cst_17 : f32 to vector<8x24xf32>
    %36 = vector.extract_strided_slice %5 {offsets = [0, 0], sizes = [8, 1], strides = [1, 1]} : vector<8x9xi32> to vector<8x1xi32>
    %c9_i32 = arith.constant 9 : i32
    %37 = vector.broadcast %c9_i32 : i32 to vector<8x1xi32>
    %38 = arith.muli %36, %37 : vector<8x1xi32>
    %c0_i32_18 = arith.constant 0 : i32
    %39 = vector.broadcast %c0_i32_18 : i32 to vector<8x1xi32>
    %40 = arith.addi %38, %39 : vector<8x1xi32>
    %41 = vector.broadcast %40 : vector<8x1xi32> to vector<8x24xi32>
    %42 = arith.cmpi eq, %34, %41 : vector<8x24xi32>
    %43 = vector.extract_strided_slice %33 {offsets = [0, 0], sizes = [8, 1], strides = [1, 1]} : vector<8x9xf32> to vector<8x1xf32>
    %cst_19 = arith.constant 0.000000e+00 : f32
    %44 = vector.shape_cast %43 : vector<8x1xf32> to vector<8x1xf32>
    %45 = vector.broadcast %44 : vector<8x1xf32> to vector<8x24xf32>
    %46 = vector.broadcast %cst_19 : f32 to vector<8x24xf32>
    %47 = arith.select %42, %45, %46 : vector<8x24xi1>, vector<8x24xf32>
    %48 = arith.addf %35, %47 : vector<8x24xf32>
    %49 = vector.extract_strided_slice %5 {offsets = [0, 1], sizes = [8, 1], strides = [1, 1]} : vector<8x9xi32> to vector<8x1xi32>
    %c9_i32_20 = arith.constant 9 : i32
    %50 = vector.broadcast %c9_i32_20 : i32 to vector<8x1xi32>
    %51 = arith.muli %49, %50 : vector<8x1xi32>
    %c1_i32 = arith.constant 1 : i32
    %52 = vector.broadcast %c1_i32 : i32 to vector<8x1xi32>
    %53 = arith.addi %51, %52 : vector<8x1xi32>
    %54 = vector.broadcast %53 : vector<8x1xi32> to vector<8x24xi32>
    %55 = arith.cmpi eq, %34, %54 : vector<8x24xi32>
    %56 = vector.extract_strided_slice %33 {offsets = [0, 1], sizes = [8, 1], strides = [1, 1]} : vector<8x9xf32> to vector<8x1xf32>
    %cst_21 = arith.constant 0.000000e+00 : f32
    %57 = vector.shape_cast %56 : vector<8x1xf32> to vector<8x1xf32>
    %58 = vector.broadcast %57 : vector<8x1xf32> to vector<8x24xf32>
    %59 = vector.broadcast %cst_21 : f32 to vector<8x24xf32>
    %60 = arith.select %55, %58, %59 : vector<8x24xi1>, vector<8x24xf32>
    %61 = arith.addf %48, %60 : vector<8x24xf32>
    %62 = vector.extract_strided_slice %5 {offsets = [0, 2], sizes = [8, 1], strides = [1, 1]} : vector<8x9xi32> to vector<8x1xi32>
    %c9_i32_22 = arith.constant 9 : i32
    %63 = vector.broadcast %c9_i32_22 : i32 to vector<8x1xi32>
    %64 = arith.muli %62, %63 : vector<8x1xi32>
    %c2_i32 = arith.constant 2 : i32
    %65 = vector.broadcast %c2_i32 : i32 to vector<8x1xi32>
    %66 = arith.addi %64, %65 : vector<8x1xi32>
    %67 = vector.broadcast %66 : vector<8x1xi32> to vector<8x24xi32>
    %68 = arith.cmpi eq, %34, %67 : vector<8x24xi32>
    %69 = vector.extract_strided_slice %33 {offsets = [0, 2], sizes = [8, 1], strides = [1, 1]} : vector<8x9xf32> to vector<8x1xf32>
    %cst_23 = arith.constant 0.000000e+00 : f32
    %70 = vector.shape_cast %69 : vector<8x1xf32> to vector<8x1xf32>
    %71 = vector.broadcast %70 : vector<8x1xf32> to vector<8x24xf32>
    %72 = vector.broadcast %cst_23 : f32 to vector<8x24xf32>
    %73 = arith.select %68, %71, %72 : vector<8x24xi1>, vector<8x24xf32>
    %74 = arith.addf %61, %73 : vector<8x24xf32>
    %75 = vector.extract_strided_slice %5 {offsets = [0, 3], sizes = [8, 1], strides = [1, 1]} : vector<8x9xi32> to vector<8x1xi32>
    %c9_i32_24 = arith.constant 9 : i32
    %76 = vector.broadcast %c9_i32_24 : i32 to vector<8x1xi32>
    %77 = arith.muli %75, %76 : vector<8x1xi32>
    %c3_i32 = arith.constant 3 : i32
    %78 = vector.broadcast %c3_i32 : i32 to vector<8x1xi32>
    %79 = arith.addi %77, %78 : vector<8x1xi32>
    %80 = vector.broadcast %79 : vector<8x1xi32> to vector<8x24xi32>
    %81 = arith.cmpi eq, %34, %80 : vector<8x24xi32>
    %82 = vector.extract_strided_slice %33 {offsets = [0, 3], sizes = [8, 1], strides = [1, 1]} : vector<8x9xf32> to vector<8x1xf32>
    %cst_25 = arith.constant 0.000000e+00 : f32
    %83 = vector.shape_cast %82 : vector<8x1xf32> to vector<8x1xf32>
    %84 = vector.broadcast %83 : vector<8x1xf32> to vector<8x24xf32>
    %85 = vector.broadcast %cst_25 : f32 to vector<8x24xf32>
    %86 = arith.select %81, %84, %85 : vector<8x24xi1>, vector<8x24xf32>
    %87 = arith.addf %74, %86 : vector<8x24xf32>
    %88 = vector.extract_strided_slice %5 {offsets = [0, 4], sizes = [8, 1], strides = [1, 1]} : vector<8x9xi32> to vector<8x1xi32>
    %c9_i32_26 = arith.constant 9 : i32
    %89 = vector.broadcast %c9_i32_26 : i32 to vector<8x1xi32>
    %90 = arith.muli %88, %89 : vector<8x1xi32>
    %c4_i32 = arith.constant 4 : i32
    %91 = vector.broadcast %c4_i32 : i32 to vector<8x1xi32>
    %92 = arith.addi %90, %91 : vector<8x1xi32>
    %93 = vector.broadcast %92 : vector<8x1xi32> to vector<8x24xi32>
    %94 = arith.cmpi eq, %34, %93 : vector<8x24xi32>
    %95 = vector.extract_strided_slice %33 {offsets = [0, 4], sizes = [8, 1], strides = [1, 1]} : vector<8x9xf32> to vector<8x1xf32>
    %cst_27 = arith.constant 0.000000e+00 : f32
    %96 = vector.shape_cast %95 : vector<8x1xf32> to vector<8x1xf32>
    %97 = vector.broadcast %96 : vector<8x1xf32> to vector<8x24xf32>
    %98 = vector.broadcast %cst_27 : f32 to vector<8x24xf32>
    %99 = arith.select %94, %97, %98 : vector<8x24xi1>, vector<8x24xf32>
    %100 = arith.addf %87, %99 : vector<8x24xf32>
    %101 = vector.extract_strided_slice %5 {offsets = [0, 5], sizes = [8, 1], strides = [1, 1]} : vector<8x9xi32> to vector<8x1xi32>
    %c9_i32_28 = arith.constant 9 : i32
    %102 = vector.broadcast %c9_i32_28 : i32 to vector<8x1xi32>
    %103 = arith.muli %101, %102 : vector<8x1xi32>
    %c5_i32 = arith.constant 5 : i32
    %104 = vector.broadcast %c5_i32 : i32 to vector<8x1xi32>
    %105 = arith.addi %103, %104 : vector<8x1xi32>
    %106 = vector.broadcast %105 : vector<8x1xi32> to vector<8x24xi32>
    %107 = arith.cmpi eq, %34, %106 : vector<8x24xi32>
    %108 = vector.extract_strided_slice %33 {offsets = [0, 5], sizes = [8, 1], strides = [1, 1]} : vector<8x9xf32> to vector<8x1xf32>
    %cst_29 = arith.constant 0.000000e+00 : f32
    %109 = vector.shape_cast %108 : vector<8x1xf32> to vector<8x1xf32>
    %110 = vector.broadcast %109 : vector<8x1xf32> to vector<8x24xf32>
    %111 = vector.broadcast %cst_29 : f32 to vector<8x24xf32>
    %112 = arith.select %107, %110, %111 : vector<8x24xi1>, vector<8x24xf32>
    %113 = arith.addf %100, %112 : vector<8x24xf32>
    %114 = vector.extract_strided_slice %5 {offsets = [0, 6], sizes = [8, 1], strides = [1, 1]} : vector<8x9xi32> to vector<8x1xi32>
    %c9_i32_30 = arith.constant 9 : i32
    %115 = vector.broadcast %c9_i32_30 : i32 to vector<8x1xi32>
    %116 = arith.muli %114, %115 : vector<8x1xi32>
    %c6_i32 = arith.constant 6 : i32
    %117 = vector.broadcast %c6_i32 : i32 to vector<8x1xi32>
    %118 = arith.addi %116, %117 : vector<8x1xi32>
    %119 = vector.broadcast %118 : vector<8x1xi32> to vector<8x24xi32>
    %120 = arith.cmpi eq, %34, %119 : vector<8x24xi32>
    %121 = vector.extract_strided_slice %33 {offsets = [0, 6], sizes = [8, 1], strides = [1, 1]} : vector<8x9xf32> to vector<8x1xf32>
    %cst_31 = arith.constant 0.000000e+00 : f32
    %122 = vector.shape_cast %121 : vector<8x1xf32> to vector<8x1xf32>
    %123 = vector.broadcast %122 : vector<8x1xf32> to vector<8x24xf32>
    %124 = vector.broadcast %cst_31 : f32 to vector<8x24xf32>
    %125 = arith.select %120, %123, %124 : vector<8x24xi1>, vector<8x24xf32>
    %126 = arith.addf %113, %125 : vector<8x24xf32>
    %127 = vector.extract_strided_slice %5 {offsets = [0, 7], sizes = [8, 1], strides = [1, 1]} : vector<8x9xi32> to vector<8x1xi32>
    %c9_i32_32 = arith.constant 9 : i32
    %128 = vector.broadcast %c9_i32_32 : i32 to vector<8x1xi32>
    %129 = arith.muli %127, %128 : vector<8x1xi32>
    %c7_i32 = arith.constant 7 : i32
    %130 = vector.broadcast %c7_i32 : i32 to vector<8x1xi32>
    %131 = arith.addi %129, %130 : vector<8x1xi32>
    %132 = vector.broadcast %131 : vector<8x1xi32> to vector<8x24xi32>
    %133 = arith.cmpi eq, %34, %132 : vector<8x24xi32>
    %134 = vector.extract_strided_slice %33 {offsets = [0, 7], sizes = [8, 1], strides = [1, 1]} : vector<8x9xf32> to vector<8x1xf32>
    %cst_33 = arith.constant 0.000000e+00 : f32
    %135 = vector.shape_cast %134 : vector<8x1xf32> to vector<8x1xf32>
    %136 = vector.broadcast %135 : vector<8x1xf32> to vector<8x24xf32>
    %137 = vector.broadcast %cst_33 : f32 to vector<8x24xf32>
    %138 = arith.select %133, %136, %137 : vector<8x24xi1>, vector<8x24xf32>
    %139 = arith.addf %126, %138 : vector<8x24xf32>
    %140 = vector.extract_strided_slice %5 {offsets = [0, 8], sizes = [8, 1], strides = [1, 1]} : vector<8x9xi32> to vector<8x1xi32>
    %c9_i32_34 = arith.constant 9 : i32
    %141 = vector.broadcast %c9_i32_34 : i32 to vector<8x1xi32>
    %142 = arith.muli %140, %141 : vector<8x1xi32>
    %c8_i32 = arith.constant 8 : i32
    %143 = vector.broadcast %c8_i32 : i32 to vector<8x1xi32>
    %144 = arith.addi %142, %143 : vector<8x1xi32>
    %145 = vector.broadcast %144 : vector<8x1xi32> to vector<8x24xi32>
    %146 = arith.cmpi eq, %34, %145 : vector<8x24xi32>
    %147 = vector.extract_strided_slice %33 {offsets = [0, 8], sizes = [8, 1], strides = [1, 1]} : vector<8x9xf32> to vector<8x1xf32>
    %cst_35 = arith.constant 0.000000e+00 : f32
    %148 = vector.shape_cast %147 : vector<8x1xf32> to vector<8x1xf32>
    %149 = vector.broadcast %148 : vector<8x1xf32> to vector<8x24xf32>
    %150 = vector.broadcast %cst_35 : f32 to vector<8x24xf32>
    %151 = arith.select %146, %149, %150 : vector<8x24xi1>, vector<8x24xf32>
    %152 = arith.addf %139, %151 : vector<8x24xf32>
    %153 = arith.truncf %152 : vector<8x24xf32> to vector<8x24xbf16>
    %154 = arith.extf %153 : vector<8x24xbf16> to vector<8x24xf32>
    %155 = arith.subf %152, %154 : vector<8x24xf32>
    %156 = arith.truncf %155 : vector<8x24xf32> to vector<8x24xbf16>
    %157 = arith.extf %156 : vector<8x24xbf16> to vector<8x24xf32>
    %158 = arith.subf %155, %157 : vector<8x24xf32>
    %159 = arith.truncf %158 : vector<8x24xf32> to vector<8x24xbf16>
    %cst_36 = arith.constant dense<0.000000e+00> : vector<8x117xf32>
    %160 = tpu.matmul %153, %7, %cst_36 {dimension_numbers = #tpu.dot_dimension_numbers<[1], [0], [0], [1], [0, 0, 1, 1], [], []>} : vector<8x24xbf16>, vector<24x117xbf16>, vector<8x117xf32> -> vector<8x117xf32>
    %cst_37 = arith.constant dense<0.000000e+00> : vector<8x117xf32>
    %161 = tpu.matmul %156, %7, %cst_37 {dimension_numbers = #tpu.dot_dimension_numbers<[1], [0], [0], [1], [0, 0, 1, 1], [], []>} : vector<8x24xbf16>, vector<24x117xbf16>, vector<8x117xf32> -> vector<8x117xf32>
    %162 = arith.addf %160, %161 : vector<8x117xf32>
    %cst_38 = arith.constant dense<0.000000e+00> : vector<8x117xf32>
    %163 = tpu.matmul %159, %7, %cst_38 {dimension_numbers = #tpu.dot_dimension_numbers<[1], [0], [0], [1], [0, 0, 1, 1], [], []>} : vector<8x24xbf16>, vector<24x117xbf16>, vector<8x117xf32> -> vector<8x117xf32>
    %164 = arith.addf %162, %163 : vector<8x117xf32>
    %165 = arith.subf %3, %4 : vector<8x117xf32>
    %166 = arith.mulf %164, %165 : vector<8x117xf32>
    %c0_39 = arith.constant 0 : index
    %c0_40 = arith.constant 0 : index
    %c0_41 = arith.constant 0 : index
    %167 = vector.load %arg7[%c0_39, %c0_40, %c0_41] : memref<1x8x117xf32, #tpu.memory_space<vmem>>, vector<1x8x117xf32>
    %168 = math.absf %166 : vector<8x117xf32>
    %169 = vector.shape_cast %168 : vector<8x117xf32> to vector<1x8x117xf32>
    %cst_42 = arith.constant dense<0.000000e+00> : vector<8x117xf32>
    %170 = vector.multi_reduction <add>, %169, %cst_42 [0] : vector<1x8x117xf32> to vector<8x117xf32>
    %171 = vector.shape_cast %170 : vector<8x117xf32> to vector<1x8x117xf32>
    %172 = arith.addf %167, %171 : vector<1x8x117xf32>
    %c0_43 = arith.constant 0 : index
    %c0_44 = arith.constant 0 : index
    %c0_45 = arith.constant 0 : index
    %173 = vector.load %arg7[%c0_43, %c0_44, %c0_45] : memref<1x8x117xf32, #tpu.memory_space<vmem>>, vector<1x8x117xf32>
    tpu.vector_store %arg7[%c0_43, %c0_44, %c0_45], %172 {strides = array<i32>} : memref<1x8x117xf32, #tpu.memory_space<vmem>>, vector<1x8x117xf32>,
    %c0_46 = arith.constant 0 : index
    %c0_47 = arith.constant 0 : index
    %c0_48 = arith.constant 0 : index
    %174 = vector.load %arg8[%c0_46, %c0_47, %c0_48] : memref<1x8x117xf32, #tpu.memory_space<vmem>>, vector<1x8x117xf32>
    %175 = arith.mulf %166, %166 : vector<8x117xf32>
    %176 = vector.shape_cast %175 : vector<8x117xf32> to vector<1x8x117xf32>
    %cst_49 = arith.constant dense<0.000000e+00> : vector<8x117xf32>
    %177 = vector.multi_reduction <add>, %176, %cst_49 [0] : vector<1x8x117xf32> to vector<8x117xf32>
    %178 = vector.shape_cast %177 : vector<8x117xf32> to vector<1x8x117xf32>
    %179 = arith.addf %174, %178 : vector<1x8x117xf32>
    %c0_50 = arith.constant 0 : index
    %c0_51 = arith.constant 0 : index
    %c0_52 = arith.constant 0 : index
    %180 = vector.load %arg8[%c0_50, %c0_51, %c0_52] : memref<1x8x117xf32, #tpu.memory_space<vmem>>, vector<1x8x117xf32>
    tpu.vector_store %arg8[%c0_50, %c0_51, %c0_52], %179 {strides = array<i32>} : memref<1x8x117xf32, #tpu.memory_space<vmem>>, vector<1x8x117xf32>,
    return
  }
  func.func @transform_0(%arg0: i32, %arg1: i32) -> (i32, i32) {
    %c1_i32 = arith.constant 1 : i32
    %0 = arith.muli %arg0, %c1_i32 : i32
    %1 = arith.addi %0, %arg1 : i32
    %c0_i32 = arith.constant 0 : i32
    %c0_i32_0 = arith.constant 0 : i32
    return %1, %c0_i32 : i32, i32
  }
  func.func @transform_1(%arg0: i32, %arg1: i32) -> (i32, i32) {
    %c1_i32 = arith.constant 1 : i32
    %0 = arith.muli %arg0, %c1_i32 : i32
    %1 = arith.addi %0, %arg1 : i32
    %c0_i32 = arith.constant 0 : i32
    %c0_i32_0 = arith.constant 0 : i32
    return %1, %c0_i32 : i32, i32
  }
  func.func @transform_2(%arg0: i32, %arg1: i32) -> (i32, i32) {
    %c1_i32 = arith.constant 1 : i32
    %0 = arith.muli %arg0, %c1_i32 : i32
    %1 = arith.addi %0, %arg1 : i32
    %c0_i32 = arith.constant 0 : i32
    %c0_i32_0 = arith.constant 0 : i32
    return %1, %c0_i32 : i32, i32
  }
  func.func @transform_3(%arg0: i32, %arg1: i32) -> (i32, i32) {
    %c0_i32 = arith.constant 0 : i32
    %c0_i32_0 = arith.constant 0 : i32
    %c0_i32_1 = arith.constant 0 : i32
    return %c0_i32, %c0_i32_0 : i32, i32
  }
  func.func @transform_4(%arg0: i32, %arg1: i32) -> (i32, i32) {
    %c0_i32 = arith.constant 0 : i32
    %c0_i32_0 = arith.constant 0 : i32
    %c0_i32_1 = arith.constant 0 : i32
    return %c0_i32, %c0_i32_0 : i32, i32
  }
  func.func @transform_5(%arg0: i32, %arg1: i32) -> (i32, i32, i32) {
    %c0_i32 = arith.constant 0 : i32
    %c0_i32_0 = arith.constant 0 : i32
    %c0_i32_1 = arith.constant 0 : i32
    return %arg0, %c0_i32, %c0_i32_0 : i32, i32, i32
  }
  func.func @transform_6(%arg0: i32, %arg1: i32) -> (i32, i32, i32) {
    %c0_i32 = arith.constant 0 : i32
    %c0_i32_0 = arith.constant 0 : i32
    %c0_i32_1 = arith.constant 0 : i32
    return %arg0, %c0_i32, %c0_i32_0 : i32, i32, i32
  }
}

</mosaic_0001>

<bundles_post_ra>
// kernel: hamil_loss.3
= control target key start
LH: loop header
LB: loop body
LE: loop exit
PB: predicated region body
PF: predicated region fallthrough
CT: control target
= control target key end

     0   :  { %vm157_vm0 = vcmask 1045504   ;;  %vm158_vm1 = vcmask 1046528   ;;  %v493_v2 = vmov 65535   ;;  %vm78_vm2 = vcmask 1022976   ;;  %s610_s3 = inlined_call_operand.vmem [shape: bf16[125,5], index: 3, kind: input, shape index: {}]   ;;  %s611_s1 = inlined_call_operand.vmem [shape: f32[8,125], index: 1, kind: input, shape index: {}]   ;;  %s612_s2 = inlined_call_operand.vmem [shape: s32[8,5], index: 2, kind: input, shape index: {}]   ;;  %s613_s4 = inlined_call_operand.vmem [shape: bf16[16,125], index: 4, kind: input, shape index: {}]   ;;  %s614_s5 = inlined_call_operand.vmem [shape: f32[1,8,125], index: 5, kind: output, shape index: {0}]   ;;  %s615_s6 = inlined_call_operand.vmem [shape: f32[1,8,125], index: 6, kind: output, shape index: {1}]   ;;  %s616_s0 = inlined_call_operand.vmem [shape: f32[8,125], index: 0, kind: input, shape index: {}]  }
   0x1   :  { %v451_v0 = vld [vmem:[%s610_s3 + $0x38] sm:$0xf]  ;;  %v471_v1 = vld [vmem:[%s610_s3 + $0x38] sm:$0x70]  ;;  %v159_v3 = vsel %vm157_vm0, 4294967295, %v493_v2  ;;  %v470_v7 = vld [vmem:[%s610_s3 + $0x30] sm:$0xff] }
   0x2   :  { %v452_v4 = vor.u32 %v471_v1, %v451_v0  ;;  %v160_v5 = vsel %vm158_vm1, %v159_v3, 0  ;;  %v469_v8 = vld [vmem:[%s610_s3 + $0x28] sm:$0xff]  ;;  %v468_v9 = vld [vmem:[%s610_s3 + $0x20] sm:$0xff]  ;;  %v467_v11 = vld [vmem:[%s610_s3 + $0x18] sm:$0xff]  ;;  %v494_v27 = vmov 3   ;;  %v495_v29 = vmov 2  }
   0x3   :  { %v553_v10 = vld [vmem:[%s611_s1] sm:$0xff]  ;;  %v466_v14 = vld [vmem:[%s610_s3 + $0x10] sm:$0xff]  ;;  %v465_v17 = vld [vmem:[%s610_s3 + $0x8] sm:$0xff]  ;;  %483 = vset.pattern.permute.xlu1 %v494_v27  ;;  %482 = vset.pattern.permute.xlu2 %v495_v29  ;;  %v496_v31 = vmov 0   ;;  %v497_v49 = vmov 1   ;;  %v498_v56 = vmov 4  }
   0x4   :  { %v162_v6 = vand.u32 %v452_v4, %v160_v5  ;;  %v193_v12 = vmul.f32 %v553_v10, %v553_v10  ;;  %v102_v13 = vpack.c.bf16 %v553_v10, %v553_v10  ;;  %v464_v20 = vld [vmem:[%s610_s3] sm:$0xff]  ;;  %480 = vset.pattern.permute.xlu0 %v496_v31  ;;  %vm333_vm14 = vcmask 130048  }
   0x5   :  { %v83_v24 = vld [vmem:[%s612_s2] sm:$0xff] }
   0x6   :  { %164 = vmatpush.bf16.msra.mxu0 %v162_v6  ;;  %180 = vmatpush.bf16.msra.mxu1 %v162_v6  ;;  %v194_v15 = vpack.c.bf16 %v193_v12, %v193_v12  ;;  %v103_v16 = vunpack.c.l.bf16 %v102_v13  ;;  %v264_v28 = vmul.u32 5, %v83_v24 }
   0x7   :  { %201 = vmatpush.bf16.msra.mxu2 %v162_v6  ;;  %217 = vmatpush.bf16.msra.mxu3 %v162_v6  ;;  %v472_v6 = vld [vmem:[%s613_s4] sm:$0xff] }
   0x8   :  { %v195_v18 = vunpack.c.l.bf16 %v194_v15  ;;  %v104_v19 = vsub.f32 %v553_v10, %v103_v16  ;;  %v298_v32 = vadd.s32 3, %v264_v28  ;;  %v287_v33 = vadd.s32 2, %v264_v28  ;;  %266 = vperm.xlu0 %480, %v264_v28  }
   0x9   :  { %v276_v47 = vadd.s32 1, %v264_v28  ;;  %v309_v54 = vadd.s32 4, %v264_v28 }
   0xa   :  { %165 = vmatpush.bf16.msra.mxu0 %v470_v7  ;;  %181 = vmatpush.bf16.msra.mxu1 %v470_v7  ;;  %v196_v21 = vsub.f32 %v193_v12, %v195_v18  ;;  %v105_v22 = vpack.c.bf16 %v104_v19, %v104_v19  ;;  %v262_v12 = vlaneseq }
   0xb   :  { %202 = vmatpush.bf16.msra.mxu2 %v470_v7  ;;  %218 = vmatpush.bf16.msra.mxu3 %v470_v7 }
   0xc   :  { %v197_v23 = vpack.c.bf16 %v196_v21, %v196_v21  ;;  %300 = vperm.xlu1 %483, %v298_v32   ;;  %289 = vperm.xlu2 %482, %v287_v33  }
   0xe   :  { %166 = vmatpush.bf16.msra.mxu0 %v469_v8  ;;  %182 = vmatpush.bf16.msra.mxu1 %v469_v8 }
   0xf   :  { %203 = vmatpush.bf16.msra.mxu2 %v469_v8  ;;  %219 = vmatpush.bf16.msra.mxu3 %v469_v8 }
  0x10   :  { %481 = vset.pattern.permute.xlu0 %v497_v49 }
  0x11   :  { %278 = vperm.xlu0 %481, %v276_v47  }
  0x12   :  { %167 = vmatpush.bf16.msra.mxu0 %v468_v9  ;;  %183 = vmatpush.bf16.msra.mxu1 %v468_v9 }
  0x13   :  { %204 = vmatpush.bf16.msra.mxu2 %v468_v9  ;;  %220 = vmatpush.bf16.msra.mxu3 %v468_v9 }
  0x14   :  { %484 = vset.pattern.permute.xlu1 %v496_v31 }
  0x16   :  { %168 = vmatpush.bf16.msra.mxu0 %v467_v11  ;;  %184 = vmatpush.bf16.msra.mxu1 %v467_v11 }
  0x17   :  { %205 = vmatpush.bf16.msra.mxu2 %v467_v11  ;;  %221 = vmatpush.bf16.msra.mxu3 %v467_v11 }
  0x19   :  { %487 = vset.pattern.permute.xlu0 %v498_v56 }
  0x1a   :  { %169 = vmatpush.bf16.msra.mxu0 %v466_v14  ;;  %185 = vmatpush.bf16.msra.mxu1 %v466_v14 }
  0x1b   :  { %206 = vmatpush.bf16.msra.mxu2 %v466_v14  ;;  %222 = vmatpush.bf16.msra.mxu3 %v466_v14 }
  0x1c   :  { %311 = vperm.xlu0 %487, %v309_v54  }
  0x1e   :  { %170 = vmatpush.bf16.msra.mxu0 %v465_v17  ;;  %186 = vmatpush.bf16.msra.mxu1 %v465_v17 }
  0x1f   :  { %207 = vmatpush.bf16.msra.mxu2 %v465_v17  ;;  %223 = vmatpush.bf16.msra.mxu3 %v465_v17 }
  0x22   :  { %171 = vmatpush.bf16.msra.mxu0 %v464_v20  ;;  %187 = vmatpush.bf16.msra.mxu1 %v464_v20 }
  0x23   :  { %208 = vmatpush.bf16.msra.mxu2 %v464_v20  ;;  %224 = vmatpush.bf16.msra.mxu3 %v464_v20 }
  0x25   :  { %453 = vmatmul.msk.bf16.vlgmr.msra.gmra.mxu0 %vm78_vm2, %v105_v22  ;;  %454 = vmatmul.msk.bf16.vlgmr.msra.gmra.mxu1 %vm78_vm2, %v102_v13 }
  0x26   :  { %455 = vmatmul.msk.bf16.vlgmr.msra.gmra.mxu2 %vm78_vm2, %v197_v23  ;;  %456 = vmatmul.msk.bf16.vlgmr.msra.gmra.mxu3 %vm78_vm2, %v194_v15  ;;  %v263_v15 = vand.u32 127, %v262_v12 }
  0x27   :  { %376 = vmatpush.bf16.msrb.mxu2 %v472_v6  ;;  %360 = vmatpush.bf16.msrb.mxu1 %v472_v6 }
  0x28   :  { %344 = vmatpush.bf16.msrb.mxu0 %v472_v6 }
  0x66   :  { %v290_v9 = vpop.permute.xlu2 %289 }
  0x67   :  { %vm291_vm11 = vcmp.eq.s32.totalorder %v263_v15, %v290_v9 }
  0x7a   :  { %v267_v8 = vpop.permute.xlu0 %266 }
  0x7b   :  { %vm268_vm9 = vcmp.eq.s32.totalorder %v263_v15, %v267_v8 }
  0x7e   :  { %v301_v7 = vpop.permute.xlu1 %300 }
  0x7f   :  { %vm302_vm12 = vcmp.eq.s32.totalorder %v263_v15, %v301_v7 }
  0x83   :  { %v279_v13 = vpop.permute.xlu0 %278 }
  0x84   :  { %vm280_vm10 = vcmp.eq.s32.totalorder %v263_v15, %v279_v13 }
  0x8e   :  { %v312_v21 = vpop.permute.xlu0 %311 }
  0x8f   :  { %vm313_vm13 = vcmp.eq.s32.totalorder %v263_v15, %v312_v21 }
  0xa2   :  { %v173_v25 = vpop.f32.mrf.mxu0  ;;  %v189_v26 = vpop.f32.mrf.mxu1 }
  0xa3   :  { %v190_v30 = vadd.f32 %v189_v26, %v173_v25 }
  0xa5   :  { %v230_v34 = vmul.f32 %v190_v30, %v190_v30 }
  0xa7   :  { %v231_v35 = vmul.f32 0.04, %v230_v34 }
  0xa9   :  { %v210_v36 = vpop.f32.mrf.mxu2  ;;  %v226_v37 = vpop.f32.mrf.mxu3 }
  0xaa   :  { %v227_v38 = vadd.f32 %v226_v37, %v210_v36  ;;  %v175_v39 = vpop.f32.mrf.mxu0  ;;  %v191_v40 = vpop.f32.mrf.mxu1  ;;  %v499_v36 = vmov 0.0  }
  0xab   :  { %79 = vst.msk [vmem:[%s614_s5] sm:$0xff] %vm78_vm2, %v499_v36 }
  0xac   :  { %v232_v41 = vsub.f32 %v227_v38, %v231_v35  ;;  %80 = vst.msk [vmem:[%s615_s6] sm:$0xff] %vm78_vm2, %v499_v36 }
  0xae   :  { %v233_v42 = vmax.f32 %v232_v41, 0.0  ;;  %v81_v41 = vld [vmem:[%s616_s0] sm:$0xff] }
  0xb0   :  { %489 = vrsqrt.f32 %v233_v42  ;;  %vm241_vm3 = vcmp.eq.f32.partialorder %v233_v42, inf  ;;  %v244_v55 = vand.u32 2147483648, %v233_v42  ;;  %vm243_vm4 = vcmp.eq.f32.partialorder %v233_v42, 0.0 }
  0xb1   :  { %v212_v43 = vpop.f32.mrf.mxu2  ;;  %v228_v44 = vpop.f32.mrf.mxu3 }
  0xb2   :  { %v383_v43 = vsub.f32 %v81_v41, %v553_v10  ;;  %v385_v47 = vld [vmem:[%s614_s5] sm:$0xff] }
  0xb6   :  { %v490_v45 = vpop.eup %489 }
  0xb7   :  { %v235_v46 = vmul.f32 %v490_v45, %v233_v42 }
  0xb9   :  { %v236_v48 = vmul.f32 %v490_v45, %v235_v46 }
  0xbb   :  { %v237_v50 = vmul.f32 0.5, %v236_v48  ;;  %v390_v48 = vld [vmem:[%s615_s6] sm:$0xff] }
  0xbd   :  { %v238_v51 = vsub.f32 1.5, %v237_v50 }
  0xbf   :  { %v239_v52 = vmul.f32 %v490_v45, %v238_v51 }
  0xc1   :  { %v240_v53 = vmul.f32 %v239_v52, %v233_v42 }
  0xc3   :  { %v242_v57 = vsel %vm241_vm3, %v233_v42, %v240_v53 }
  0xc4   :  { %v245_v58 = vsel %vm243_vm4, %v244_v55, %v242_v57 }
  0xc5   :  { %v246_v59 = vadd.f32 1e-05, %v245_v58 }
  0xc7   :  { %491 = vrcp.f32 %v246_v59  ;;  %v258_v63 = vand.u32 2147483648, %v246_v59  ;;  %v256_v1 = vand.u32 2147483647, %v246_v59  ;;  %vm252_vm6 = vweird.f32 %v246_v59 }
  0xc9   :  { %v259_v3 = vor.u32 1.1754944e-38, %v258_v63  ;;  %vm257_vm8 = vcmp.eq.f32.partialorder %v256_v1, 8.507059e+37 }
  0xcd   :  { %v492_v60 = vpop.eup %491 }
  0xce   :  { %v248_v61 = vmul.f32 %v492_v60, %v246_v59  ;;  %vm253_vm5 = vweird.f32 %v492_v60 }
  0xcf   :  { %vm254_vm7 = vmor %vm252_vm6, %vm253_vm5 }
  0xd0   :  { %v249_v62 = vsub.f32 1.0, %v248_v61 }
  0xd2   :  { %v250_v0 = vmul.f32 %v492_v60, %v249_v62 }
  0xd4   :  { %v251_v2 = vadd.f32 %v492_v60, %v250_v0 }
  0xd6   :  { %v255_v4 = vsel %vm254_vm7, %v492_v60, %v251_v2 }
  0xd7   :  { %v260_v5 = vsel %vm257_vm8, %v259_v3, %v255_v4 }
  0xd8   :  { %293 = vperm.xlu2 %482, %v260_v5   ;;  %271 = vperm.xlu1 %484, %v260_v5  }
  0xe0   :  { %486 = vset.pattern.permute.xlu2 %v494_v27  ;;  %485 = vset.pattern.permute.xlu1 %v497_v49 }
  0xe1   :  { %304 = vperm.xlu2 %486, %v260_v5   ;;  %282 = vperm.xlu1 %485, %v260_v5  }
  0xe9   :  { %488 = vset.pattern.permute.xlu1 %v498_v56 }
  0xea   :  { %315 = vperm.xlu1 %488, %v260_v5  }
 0x132   :  { %v294_v14 = vpop.permute.xlu2 %293 }
 0x133   :  { %v296_v20 = vsel %vm291_vm11, %v294_v14, 0.0 }
 0x13b   :  { %v305_v22 = vpop.permute.xlu2 %304 }
 0x13c   :  { %v307_v24 = vsel %vm302_vm12, %v305_v22, 0.0 }
 0x14a   :  { %v272_v11 = vpop.permute.xlu1 %271 }
 0x14b   :  { %v274_v17 = vsel %vm268_vm9, %v272_v11, 0.0 }
 0x153   :  { %v283_v16 = vpop.permute.xlu1 %282 }
 0x154   :  { %v285_v18 = vsel %vm280_vm10, %v283_v16, 0.0 }
 0x155   :  { %v286_v19 = vadd.f32 %v285_v18, %v274_v17 }
 0x157   :  { %v297_v23 = vadd.f32 %v296_v20, %v286_v19 }
 0x159   :  { %v308_v25 = vadd.f32 %v307_v24, %v297_v23 }
 0x15c   :  { %v316_v26 = vpop.permute.xlu1 %315 }
 0x15d   :  { %v318_v27 = vsel %vm313_vm13, %v316_v26, 0.0 }
 0x15e   :  { %v319_v28 = vadd.f32 %v318_v27, %v308_v25 }
 0x160   :  { %v320_v29 = vpack.c.bf16 %v319_v28, %v319_v28 }
 0x162   :  { %v321_v30 = vunpack.c.l.bf16 %v320_v29  ;;  %462 = vmatmul.msk.bf16.vlgmr.msrb.gmra.mxu1 %vm333_vm14, %v320_v29 }
 0x164   :  { %v322_v31 = vsub.f32 %v319_v28, %v321_v30 }
 0x166   :  { %v323_v32 = vpack.c.bf16 %v322_v31, %v322_v31 }
 0x168   :  { %v324_v33 = vunpack.c.l.bf16 %v323_v32  ;;  %461 = vmatmul.msk.bf16.vlgmr.msrb.gmra.mxu0 %vm333_vm14, %v323_v32 }
 0x16a   :  { %v325_v34 = vsub.f32 %v322_v31, %v324_v33 }
 0x16c   :  { %v326_v35 = vpack.c.bf16 %v325_v34, %v325_v34 }
 0x16e   :  { %463 = vmatmul.msk.bf16.vlgmr.msrb.gmra.mxu2 %vm333_vm14, %v326_v35 }
 0x1df   :  { %v362_v37 = vpop.f32.mrf.mxu1 }
 0x1e5   :  { %v346_v38 = vpop.f32.mrf.mxu0 }
 0x1e6   :  { %v363_v42 = vadd.f32 %v362_v37, %v346_v38 }
 0x1e7   :  { %v364_v39 = vpop.f32.mrf.mxu1 }
 0x1ed   :  { %v348_v40 = vpop.f32.mrf.mxu0 }
 0x1f1   :  { %v378_v44 = vpop.f32.mrf.mxu2 }
 0x1f2   :  { %v382_v45 = vadd.f32 %v378_v44, %v363_v42 }
 0x1f4   :  { %v384_v46 = vmul.f32 %v383_v43, %v382_v45 }
 0x1f6   :  { %v386_v49 = vand.u32 2147483647, %v384_v46  ;;  %v391_v50 = vmul.f32 %v384_v46, %v384_v46 }
 0x1f8   :  { %v388_v51 = vadd.f32 %v386_v49, %v385_v47  ;;  %v393_v52 = vadd.f32 %v391_v50, %v390_v48 }
 0x1f9   :  { %v380_v53 = vpop.f32.mrf.mxu2 }
 0x1fa   :  { %389 = vst.msk [vmem:[%s614_s5] sm:$0xff] %vm78_vm2, %v388_v51 }
 0x1fb   :  { %394 = vst.msk [vmem:[%s615_s6] sm:$0xff] %vm78_vm2, %v393_v52 }

// kernel: hamil_loss.2
= control target key start
LH: loop header
LB: loop body
LE: loop exit
PB: predicated region body
PF: predicated region fallthrough
CT: control target
= control target key end

     0   :  { %vm155_vm0 = vcmask 1041408   ;;  %vm156_vm1 = vcmask 1042432   ;;  %v551_v1 = vmov 65535   ;;  %vm78_vm2 = vcmask 957440   ;;  %s685_s3 = inlined_call_operand.vmem [shape: bf16[117,9], index: 3, kind: input, shape index: {}]   ;;  %s686_s1 = inlined_call_operand.vmem [shape: f32[8,117], index: 1, kind: input, shape index: {}]   ;;  %s687_s2 = inlined_call_operand.vmem [shape: s32[8,9], index: 2, kind: input, shape index: {}]   ;;  %s688_s4 = inlined_call_operand.vmem [shape: bf16[24,117], index: 4, kind: input, shape index: {}]   ;;  %s689_s5 = inlined_call_operand.vmem [shape: f32[1,8,117], index: 5, kind: output, shape index: {0}]   ;;  %s690_s6 = inlined_call_operand.vmem [shape: f32[1,8,117], index: 6, kind: output, shape index: {1}]   ;;  %s691_s0 = inlined_call_operand.vmem [shape: f32[8,117], index: 0, kind: input, shape index: {}]  }
   0x1   :  { %v98_v0 = vld [vmem:[%s685_s3 + $0x38] sm:$0x7]  ;;  %v157_v2 = vsel %vm155_vm0, 4294967295, %v551_v1  ;;  %v515_v7 = vld [vmem:[%s685_s3 + $0x30] sm:$0xff]  ;;  %v514_v8 = vld [vmem:[%s685_s3 + $0x28] sm:$0xff]  ;;  %v552_v27 = vmov 2  }
   0x2   :  { %v135_v3 = vunpack.c.l.b16 %v98_v0  ;;  %v158_v4 = vsel %vm156_vm1, %v157_v2, 0  ;;  %v513_v9 = vld [vmem:[%s685_s3 + $0x20] sm:$0xff]  ;;  %v512_v11 = vld [vmem:[%s685_s3 + $0x18] sm:$0xff]  ;;  %v511_v14 = vld [vmem:[%s685_s3 + $0x10] sm:$0xff]  ;;  %530 = vset.pattern.permute.xlu2 %v552_v27  ;;  %v553_v28 = vmov 0   ;;  %v554_v35 = vmov 1  }
   0x3   :  { %v612_v10 = vld [vmem:[%s686_s1] sm:$0xff]  ;;  %v510_v17 = vld [vmem:[%s685_s3 + $0x8] sm:$0xff]  ;;  %528 = vset.pattern.permute.xlu0 %v553_v28  ;;  %v555_v36 = vmov 5   ;;  %v556_v38 = vmov 3   ;;  %v557_v49 = vmov 6   ;;  %v558_v50 = vmov 4  }
   0x4   :  { %v143_v5 = vpack.c.b16 %v135_v3, %v135_v3  ;;  %v191_v12 = vmul.f32 %v612_v10, %v612_v10  ;;  %v102_v13 = vpack.c.bf16 %v612_v10, %v612_v10  ;;  %v509_v20 = vld [vmem:[%s685_s3] sm:$0xff]  ;;  %531 = vset.pattern.permute.xlu1 %v556_v38  ;;  %vm382_vm9 = vcmask 1043456  }
   0x5   :  { %v83_v24 = vld [vmem:[%s687_s2] sm:$0xff] }
   0x6   :  { %v160_v6 = vand.u32 %v158_v4, %v143_v5  ;;  %v192_v15 = vpack.c.bf16 %v191_v12, %v191_v12  ;;  %v103_v16 = vunpack.c.l.bf16 %v102_v13  ;;  %v638_v25 = vmul.u32 9, %v83_v24 }
   0x8   :  { %162 = vmatpush.bf16.msra.mxu0 %v160_v6  ;;  %178 = vmatpush.bf16.msra.mxu1 %v160_v6  ;;  %v193_v18 = vunpack.c.l.bf16 %v192_v15  ;;  %v104_v19 = vsub.f32 %v612_v10, %v103_v16  ;;  %v285_v26 = vadd.s32 2, %v638_v25  ;;  %v318_v32 = vadd.s32 5, %v638_v25 }
   0x9   :  { %199 = vmatpush.bf16.msra.mxu2 %v160_v6  ;;  %215 = vmatpush.bf16.msra.mxu3 %v160_v6  ;;  %v274_v33 = vadd.s32 1, %v638_v25  ;;  %v296_v37 = vadd.s32 3, %v638_v25  ;;  %v329_v45 = vadd.s32 6, %v638_v25  ;;  %v307_v46 = vadd.s32 4, %v638_v25 }
   0xa   :  { %v194_v21 = vsub.f32 %v191_v12, %v193_v18  ;;  %v105_v22 = vpack.c.bf16 %v104_v19, %v104_v19  ;;  %264 = vperm.xlu0 %528, %v638_v25   ;;  %287 = vperm.xlu2 %530, %v285_v26   ;;  %v560_v12 = vmov 7  }
   0xb   :  { %298 = vperm.xlu1 %531, %v296_v37  }
   0xc   :  { %163 = vmatpush.bf16.msra.mxu0 %v515_v7  ;;  %179 = vmatpush.bf16.msra.mxu1 %v515_v7  ;;  %v195_v23 = vpack.c.bf16 %v194_v21, %v194_v21 }
   0xd   :  { %200 = vmatpush.bf16.msra.mxu2 %v515_v7  ;;  %216 = vmatpush.bf16.msra.mxu3 %v515_v7 }
  0x10   :  { %164 = vmatpush.bf16.msra.mxu0 %v514_v8  ;;  %180 = vmatpush.bf16.msra.mxu1 %v514_v8 }
  0x11   :  { %201 = vmatpush.bf16.msra.mxu2 %v514_v8  ;;  %217 = vmatpush.bf16.msra.mxu3 %v514_v8 }
  0x12   :  { %529 = vset.pattern.permute.xlu0 %v554_v35  ;;  %533 = vset.pattern.permute.xlu2 %v555_v36 }
  0x13   :  { %320 = vperm.xlu2 %533, %v318_v32   ;;  %276 = vperm.xlu0 %529, %v274_v33  }
  0x14   :  { %165 = vmatpush.bf16.msra.mxu0 %v513_v9  ;;  %181 = vmatpush.bf16.msra.mxu1 %v513_v9 }
  0x15   :  { %202 = vmatpush.bf16.msra.mxu2 %v513_v9  ;;  %218 = vmatpush.bf16.msra.mxu3 %v513_v9 }
  0x16   :  { %535 = vset.pattern.permute.xlu1 %v553_v28 }
  0x18   :  { %166 = vmatpush.bf16.msra.mxu0 %v512_v11  ;;  %182 = vmatpush.bf16.msra.mxu1 %v512_v11 }
  0x19   :  { %203 = vmatpush.bf16.msra.mxu2 %v512_v11  ;;  %219 = vmatpush.bf16.msra.mxu3 %v512_v11  ;;  %v559_v11 = vmov 8  }
  0x1b   :  { %534 = vset.pattern.permute.xlu2 %v557_v49  ;;  %532 = vset.pattern.permute.xlu0 %v558_v50 }
  0x1c   :  { %167 = vmatpush.bf16.msra.mxu0 %v511_v14  ;;  %183 = vmatpush.bf16.msra.mxu1 %v511_v14 }
  0x1d   :  { %204 = vmatpush.bf16.msra.mxu2 %v511_v14  ;;  %220 = vmatpush.bf16.msra.mxu3 %v511_v14  ;;  %v351_v14 = vadd.s32 8, %v638_v25 }
  0x1e   :  { %331 = vperm.xlu2 %534, %v329_v45   ;;  %309 = vperm.xlu0 %532, %v307_v46  }
  0x20   :  { %168 = vmatpush.bf16.msra.mxu0 %v510_v17  ;;  %184 = vmatpush.bf16.msra.mxu1 %v510_v17 }
  0x21   :  { %205 = vmatpush.bf16.msra.mxu2 %v510_v17  ;;  %221 = vmatpush.bf16.msra.mxu3 %v510_v17 }
  0x24   :  { %169 = vmatpush.bf16.msra.mxu0 %v509_v20  ;;  %185 = vmatpush.bf16.msra.mxu1 %v509_v20 }
  0x25   :  { %206 = vmatpush.bf16.msra.mxu2 %v509_v20  ;;  %222 = vmatpush.bf16.msra.mxu3 %v509_v20  ;;  %v101_v20 = vld [vmem:[%s688_s4 + $0x8] sm:$0xf] }
  0x26   :  { %537 = vset.pattern.permute.xlu2 %v552_v27  ;;  %541 = vset.pattern.permute.xlu0 %v557_v49  ;;  %v374_v21 = vunpack.c.l.b16 %v101_v20  ;;  %v260_v27 = vlaneseq }
  0x27   :  { %498 = vmatmul.msk.bf16.vlgmr.msra.gmra.mxu0 %vm78_vm2, %v105_v22  ;;  %499 = vmatmul.msk.bf16.vlgmr.msra.gmra.mxu1 %vm78_vm2, %v102_v13  ;;  %v340_v13 = vadd.s32 7, %v638_v25  ;;  %v516_v25 = vld [vmem:[%s688_s4] sm:$0xff] }
  0x28   :  { %500 = vmatmul.msk.bf16.vlgmr.msra.gmra.mxu2 %vm78_vm2, %v195_v23  ;;  %501 = vmatmul.msk.bf16.vlgmr.msra.gmra.mxu3 %vm78_vm2, %v192_v15  ;;  %v376_v24 = vpack.c.b16 %v374_v21, %v374_v21 }
  0x2a   :  { %v384_v26 = vsel %vm382_vm9, %v376_v24, 0 }
  0x2b   :  { %408 = vmatpush.bf16.msrb.mxu1 %v384_v26  ;;  %424 = vmatpush.bf16.msrb.mxu2 %v384_v26 }
  0x2c   :  { %392 = vmatpush.bf16.msrb.mxu0 %v384_v26 }
  0x2f   :  { %409 = vmatpush.bf16.msrb.mxu1 %v516_v25  ;;  %425 = vmatpush.bf16.msrb.mxu2 %v516_v25 }
  0x30   :  { %393 = vmatpush.bf16.msrb.mxu0 %v516_v25 }
  0x64   :  { %v288_v15 = vpop.permute.xlu2 %287 }
  0x6d   :  { %v321_v17 = vpop.permute.xlu2 %320 }
  0x78   :  { %v332_v19 = vpop.permute.xlu2 %331 }
  0x7c   :  { %v265_v23 = vpop.permute.xlu0 %264 }
  0x7d   :  { %v299_v16 = vpop.permute.xlu1 %298 }
  0xa4   :  { %v171_v29 = vpop.f32.mrf.mxu0  ;;  %v187_v30 = vpop.f32.mrf.mxu1 }
  0xa5   :  { %v188_v31 = vadd.f32 %v187_v30, %v171_v29  ;;  %v261_v30 = vand.u32 127, %v260_v27 }
  0xa7   :  { %v228_v34 = vmul.f32 %v188_v31, %v188_v31  ;;  %v277_v31 = vpop.permute.xlu0 %276  ;;  %vm266_vm11 = vcmp.eq.s32.totalorder %v261_v30, %v265_v23  ;;  %vm289_vm12 = vcmp.eq.s32.totalorder %v261_v30, %v288_v15  ;;  %vm300_vm13 = vcmp.eq.s32.totalorder %v261_v30, %v299_v16 }
  0xa8   :  { %vm278_vm10 = vcmp.eq.s32.totalorder %v261_v30, %v277_v31  ;;  %vm322_vm15 = vcmp.eq.s32.totalorder %v261_v30, %v321_v17  ;;  %vm333_vm0 = vcmp.eq.s32.totalorder %v261_v30, %v332_v19 }
  0xa9   :  { %v229_v39 = vmul.f32 0.07692308, %v228_v34 }
  0xab   :  { %v208_v40 = vpop.f32.mrf.mxu2  ;;  %v224_v41 = vpop.f32.mrf.mxu3 }
  0xac   :  { %v225_v42 = vadd.f32 %v224_v41, %v208_v40  ;;  %v173_v43 = vpop.f32.mrf.mxu0  ;;  %v189_v44 = vpop.f32.mrf.mxu1 }
  0xae   :  { %v230_v47 = vsub.f32 %v225_v42, %v229_v39 }
  0xaf   :  { %v310_v37 = vpop.permute.xlu0 %309 }
  0xb0   :  { %v231_v48 = vmax.f32 %v230_v47, 0.0  ;;  %vm311_vm14 = vcmp.eq.s32.totalorder %v261_v30, %v310_v37 }
  0xb2   :  { %547 = vrsqrt.f32 %v231_v48  ;;  %vm239_vm3 = vcmp.eq.f32.partialorder %v231_v48, inf  ;;  %v242_v60 = vand.u32 2147483648, %v231_v48  ;;  %vm241_vm4 = vcmp.eq.f32.partialorder %v231_v48, 0.0 }
  0xb3   :  { %v210_v51 = vpop.f32.mrf.mxu2  ;;  %v226_v52 = vpop.f32.mrf.mxu3 }
  0xb8   :  { %v548_v53 = vpop.eup %547 }
  0xb9   :  { %v233_v54 = vmul.f32 %v548_v53, %v231_v48 }
  0xbb   :  { %v234_v55 = vmul.f32 %v548_v53, %v233_v54 }
  0xbd   :  { %v235_v56 = vmul.f32 0.5, %v234_v55 }
  0xbf   :  { %v236_v57 = vsub.f32 1.5, %v235_v56 }
  0xc1   :  { %v237_v58 = vmul.f32 %v548_v53, %v236_v57 }
  0xc3   :  { %v238_v59 = vmul.f32 %v237_v58, %v231_v48 }
  0xc5   :  { %v240_v61 = vsel %vm239_vm3, %v231_v48, %v238_v59 }
  0xc6   :  { %v243_v62 = vsel %vm241_vm4, %v242_v60, %v240_v61  ;;  %vm378_vm4 = vcmask 195584  }
  0xc7   :  { %v244_v63 = vadd.f32 1e-05, %v243_v62 }
  0xc9   :  { %549 = vrcp.f32 %v244_v63  ;;  %v256_v3 = vand.u32 2147483648, %v244_v63  ;;  %v254_v5 = vand.u32 2147483647, %v244_v63  ;;  %vm250_vm6 = vweird.f32 %v244_v63 }
  0xcb   :  { %v257_v7 = vor.u32 1.1754944e-38, %v256_v3  ;;  %vm255_vm8 = vcmp.eq.f32.partialorder %v254_v5, 8.507059e+37  ;;  %v81_v5 = vld [vmem:[%s691_s0] sm:$0xff] }
  0xcf   :  { %v550_v0 = vpop.eup %549 }
  0xd0   :  { %v246_v1 = vmul.f32 %v550_v0, %v244_v63  ;;  %vm251_vm5 = vweird.f32 %v550_v0 }
  0xd1   :  { %vm252_vm7 = vmor %vm250_vm6, %vm251_vm5 }
  0xd2   :  { %v247_v2 = vsub.f32 1.0, %v246_v1 }
  0xd4   :  { %v248_v4 = vmul.f32 %v550_v0, %v247_v2 }
  0xd6   :  { %v249_v6 = vadd.f32 %v550_v0, %v248_v4 }
  0xd8   :  { %v253_v8 = vsel %vm252_vm7, %v550_v0, %v249_v6  ;;  %v561_v0 = vmov 0.0  }
  0xd9   :  { %v258_v9 = vsel %vm255_vm8, %v257_v7, %v253_v8  ;;  %79 = vst.msk [vmem:[%s689_s5] sm:$0xff] %vm78_vm2, %v561_v0  ;;  %v432_v7 = vsub.f32 %v81_v5, %v612_v10 }
  0xda   :  { %335 = vperm.xlu0 %541, %v258_v9   ;;  %291 = vperm.xlu2 %537, %v258_v9   ;;  %80 = vst.msk [vmem:[%s690_s6] sm:$0xff] %vm78_vm2, %v561_v0 }
  0xdb   :  { %269 = vperm.xlu1 %535, %v258_v9  }
  0xe2   :  { %538 = vset.pattern.permute.xlu2 %v556_v38  ;;  %546 = vset.pattern.permute.xlu0 %v559_v11 }
  0xe3   :  { %536 = vset.pattern.permute.xlu1 %v554_v35  ;;  %302 = vperm.xlu2 %538, %v258_v9  }
  0xe4   :  { %280 = vperm.xlu1 %536, %v258_v9  }
  0xeb   :  { %543 = vset.pattern.permute.xlu2 %v560_v12 }
  0xec   :  { %539 = vset.pattern.permute.xlu1 %v558_v50  ;;  %346 = vperm.xlu2 %543, %v258_v9  }
  0xed   :  { %313 = vperm.xlu1 %539, %v258_v9  }
  0xf4   :  { %545 = vset.pattern.permute.xlu2 %v559_v11 }
  0xf5   :  { %540 = vset.pattern.permute.xlu1 %v555_v36  ;;  %357 = vperm.xlu2 %545, %v258_v9  }
  0xf6   :  { %324 = vperm.xlu1 %540, %v258_v9  }
  0xfe   :  { %542 = vset.pattern.permute.xlu1 %v560_v12  ;;  %v434_v12 = vld [vmem:[%s689_s5] sm:$0xff] }
  0xff   :  { %342 = vperm.xlu1 %542, %v340_v13   ;;  %v439_v13 = vld [vmem:[%s690_s6] sm:$0xff] }
 0x107   :  { %544 = vset.pattern.permute.xlu1 %v559_v11 }
 0x108   :  { %353 = vperm.xlu1 %544, %v351_v14  }
 0x134   :  { %v292_v28 = vpop.permute.xlu2 %291 }
 0x135   :  { %v294_v38 = vsel %vm289_vm12, %v292_v28, 0.0 }
 0x13d   :  { %v303_v33 = vpop.permute.xlu2 %302 }
 0x13e   :  { %v305_v40 = vsel %vm300_vm13, %v303_v33, 0.0 }
 0x146   :  { %v347_v42 = vpop.permute.xlu2 %346 }
 0x14c   :  { %v336_v47 = vpop.permute.xlu0 %335 }
 0x14d   :  { %v270_v18 = vpop.permute.xlu1 %269  ;;  %v338_v49 = vsel %vm333_vm0, %v336_v47, 0.0 }
 0x14e   :  { %v272_v34 = vsel %vm266_vm11, %v270_v18, 0.0 }
 0x14f   :  { %v358_v53 = vpop.permute.xlu2 %357 }
 0x156   :  { %v281_v22 = vpop.permute.xlu1 %280 }
 0x157   :  { %v283_v32 = vsel %vm278_vm10, %v281_v22, 0.0 }
 0x158   :  { %v284_v36 = vadd.f32 %v283_v32, %v272_v34 }
 0x15a   :  { %v295_v39 = vadd.f32 %v294_v38, %v284_v36 }
 0x15c   :  { %v306_v43 = vadd.f32 %v305_v40, %v295_v39 }
 0x15f   :  { %v314_v29 = vpop.permute.xlu1 %313 }
 0x160   :  { %v316_v41 = vsel %vm311_vm14, %v314_v29, 0.0 }
 0x161   :  { %v317_v46 = vadd.f32 %v316_v41, %v306_v43 }
 0x168   :  { %v325_v35 = vpop.permute.xlu1 %324 }
 0x169   :  { %v327_v45 = vsel %vm322_vm15, %v325_v35, 0.0 }
 0x16a   :  { %v328_v48 = vadd.f32 %v327_v45, %v317_v46 }
 0x16c   :  { %v339_v51 = vadd.f32 %v338_v49, %v328_v48 }
 0x171   :  { %v343_v44 = vpop.permute.xlu1 %342 }
 0x172   :  { %vm344_vm1 = vcmp.eq.s32.totalorder %v261_v30, %v343_v44 }
 0x173   :  { %v349_v50 = vsel %vm344_vm1, %v347_v42, 0.0 }
 0x174   :  { %v350_v54 = vadd.f32 %v349_v50, %v339_v51 }
 0x17a   :  { %v354_v52 = vpop.permute.xlu1 %353 }
 0x17b   :  { %vm355_vm3 = vcmp.eq.s32.totalorder %v261_v30, %v354_v52 }
 0x17c   :  { %v360_v55 = vsel %vm355_vm3, %v358_v53, 0.0 }
 0x17d   :  { %v361_v56 = vadd.f32 %v360_v55, %v350_v54 }
 0x17f   :  { %v362_v57 = vpack.c.bf16 %v361_v56, %v361_v56 }
 0x181   :  { %v363_v58 = vunpack.c.l.bf16 %v362_v57  ;;  %507 = vmatmul.msk.bf16.vlgmr.msrb.gmra.mxu1 %vm378_vm4, %v362_v57 }
 0x183   :  { %v364_v59 = vsub.f32 %v361_v56, %v363_v58 }
 0x185   :  { %v365_v60 = vpack.c.bf16 %v364_v59, %v364_v59 }
 0x187   :  { %v366_v61 = vunpack.c.l.bf16 %v365_v60  ;;  %506 = vmatmul.msk.bf16.vlgmr.msrb.gmra.mxu0 %vm378_vm4, %v365_v60 }
 0x189   :  { %v367_v62 = vsub.f32 %v364_v59, %v366_v61 }
 0x18b   :  { %v368_v63 = vpack.c.bf16 %v367_v62, %v367_v62 }
 0x18d   :  { %508 = vmatmul.msk.bf16.vlgmr.msrb.gmra.mxu2 %vm378_vm4, %v368_v63 }
 0x1fe   :  { %v411_v1 = vpop.f32.mrf.mxu1 }
 0x204   :  { %v395_v2 = vpop.f32.mrf.mxu0 }
 0x205   :  { %v412_v6 = vadd.f32 %v411_v1, %v395_v2 }
 0x206   :  { %v413_v3 = vpop.f32.mrf.mxu1 }
 0x20c   :  { %v397_v4 = vpop.f32.mrf.mxu0 }
 0x210   :  { %v427_v8 = vpop.f32.mrf.mxu2 }
 0x211   :  { %v431_v9 = vadd.f32 %v427_v8, %v412_v6 }
 0x213   :  { %v433_v11 = vmul.f32 %v432_v7, %v431_v9 }
 0x215   :  { %v435_v14 = vand.u32 2147483647, %v433_v11  ;;  %v440_v15 = vmul.f32 %v433_v11, %v433_v11 }
 0x217   :  { %v437_v16 = vadd.f32 %v435_v14, %v434_v12  ;;  %v442_v17 = vadd.f32 %v440_v15, %v439_v13 }
 0x218   :  { %v429_v18 = vpop.f32.mrf.mxu2 }
 0x219   :  { %438 = vst.msk [vmem:[%s689_s5] sm:$0xff] %vm78_vm2, %v437_v16 }
 0x21a   :  { %443 = vst.msk [vmem:[%s690_s6] sm:$0xff] %vm78_vm2, %v442_v17 }

</bundles_post_ra>
